<compile_context>
chip_gen: v5e
topology: v5e:2x2
jax: 0.10.0
libtpu: 0.0.40
codegen_flags: <defaults>
</compile_context>

<pallas_src>
import functools
import math

import jax
import jax.numpy as jnp
from jax.experimental import pallas as pl
from jax.experimental.pallas import tpu as pltpu


# ---------------------------------------------------------------------------
# Loss hyper-parameters (module __init__ defaults)
# ---------------------------------------------------------------------------
CE_SCALE = 0.5
MIDDLE_SCALE = 0.1
LONG_SCALE = 0.1
EPS = 1e-6

LANE = 128                 # TPU lane width
TC_TILE_TARGET = 1024      # chunks (sublane rows) per grid step along time
STEP_CHUNK_BUDGET = 3072   # cap on rows_per_step * chunks_per_step
                           #   -> 4 signals * 2 buffers * f32 ~= 12.6 MiB
MAX_ROWS_PER_STEP = 8
N_STATS = 11               # t, t^2 | s, s^2, s*t | m, m^2, m*t | l, l^2, l*t
_INV_LN10 = 1.0 / math.log(10.0)


def _spex_kernel(*refs, with_ce, t_len, n_chunks, tc_tile, need_mask):
    """One grid step: (row block rb, time tile ti)."""
    if with_ce:
        (ms_ref, mm_ref, ml_ref, tg_ref, logits_ref, sid_ref,
         w_out_ref, ce_out_ref, acc_ref) = refs
    else:
        ms_ref, mm_ref, ml_ref, tg_ref, w_out_ref, acc_ref = refs
        logits_ref = sid_ref = ce_out_ref = None

    ti = pl.program_id(1)
    bm = tg_ref.shape[0]          # rows in this block

    # ---- single streaming pass over this (bm rows x tc_tile chunks) tile ----
    # Load in native dtype, upcast to f32 in-registers.
    t = tg_ref[...].astype(jnp.float32)   # (bm, tc_tile, LANE)
    s = ms_ref[...].astype(jnp.float32)
    m = mm_ref[...].astype(jnp.float32)
    l = ml_ref[...].astype(jnp.float32)

    if need_mask:
        # Partial last time tile: Pallas does NOT zero OOB block data, so zero
        # the stale chunk rows before the moment sums (jnp.where is NaN-safe).
        valid = n_chunks - ti * tc_tile
        keep = jax.lax.broadcasted_iota(jnp.int32, t.shape, 1) < valid
        t = jnp.where(keep, t, 0.0)
        s = jnp.where(keep, s, 0.0)
        m = jnp.where(keep, m, 0.0)
        l = jnp.where(keep, l, 0.0)

    if tc_tile % 8 == 0:
        # Chunk axis -> (n_sub, 8) groups: a free, tile-aligned reshape; the
        # axis-1 sum is pure VPU vreg adds (no XLU in the hot loop).
        def psum(v):
            return jnp.sum(v.reshape(bm, tc_tile // 8, 8, LANE), axis=1)
    else:
        # Tiny full-dim tile fallback (n_chunks < 8 or not a multiple of 8).
        def psum(v):
            return jnp.sum(v, axis=1, keepdims=True)

    @pl.when(ti == 0)
    def _init():
        acc_ref[...] = jnp.zeros_like(acc_ref)

    acc_ref[0] += psum(t)
    acc_ref[1] += psum(t * t)
    acc_ref[2] += psum(s)
    acc_ref[3] += psum(s * s)
    acc_ref[4] += psum(s * t)
    acc_ref[5] += psum(m)
    acc_ref[6] += psum(m * m)
    acc_ref[7] += psum(m * t)
    acc_ref[8] += psum(l)
    acc_ref[9] += psum(l * l)
    acc_ref[10] += psum(l * t)

    # ---- finalize on the last time tile ------------------------------------
    @pl.when(ti == pl.num_programs(1) - 1)
    def _finalize():
        red = jnp.sum(acc_ref[...], axis=3, keepdims=True)     # lanes
        sums = jnp.sum(red, axis=2, keepdims=True)              # sublanes
        # sums: (N_STATS, bm, 1, 1)
        s_t, s_tt = sums[0], sums[1]                             # (bm, 1, 1)
        tt = s_tt - s_t * s_t / t_len                            # ||t_zm||^2

        def sisdr_db(s_x, s_xx, s_xt):
            xt = s_xt - s_x * s_t / t_len                        # <x_zm, t_zm>
            xx = s_xx - s_x * s_x / t_len                        # ||x_zm||^2
            alpha = xt / (tt + EPS)
            proj_sq = jnp.maximum(alpha * alpha * tt, 0.0)       # ||alpha*t||^2
            err_sq = jnp.maximum(proj_sq - 2.0 * alpha * xt + xx, 0.0)
            num = jnp.sqrt(proj_sq)
            den = jnp.sqrt(err_sq)
            # 20 * log10(num / (den + eps) + eps)
            return 20.0 * _INV_LN10 * jnp.log(num / (den + EPS) + EPS)

        sd_s = sisdr_db(sums[2], sums[3], sums[4])
        sd_m = sisdr_db(sums[5], sums[6], sums[7])
        sd_l = sisdr_db(sums[8], sums[9], sums[10])

        short_w = 1.0 - MIDDLE_SCALE - LONG_SCALE
        w = -(short_w * sd_s + MIDDLE_SCALE * sd_m + LONG_SCALE * sd_l)
        w_out_ref[...] = jnp.broadcast_to(w, w_out_ref.shape)   # lane-dense

        if with_ce:
            logits = logits_ref[...].astype(jnp.float32)         # (bm, 1, C)
            sid = sid_ref[...]                                   # (bm, 1, 1)
            classes = jax.lax.broadcasted_iota(jnp.int32, logits.shape, 2)
            picked = jnp.sum(jnp.where(classes == sid, logits, 0.0),
                             axis=-1, keepdims=True)             # (bm, 1, 1)
            mx = jnp.max(logits, axis=-1, keepdims=True)
            lse = mx + jnp.log(jnp.sum(jnp.exp(logits - mx),
                                       axis=-1, keepdims=True))
            ce = lse - picked                                    # (bm, 1, 1)
            ce_out_ref[...] = jnp.broadcast_to(ce, ce_out_ref.shape)


@functools.partial(jax.jit, static_argnames=("is_train",))
def spex_plus_loss(is_train, mix_short, mix_middle, mix_long,
                   speaker_logits, speaker_id, target):
    """Pallas implementation of SpexPlusLoss.forward."""
    # Glue: squeeze channel (B, 1, T) -> (B, T).  No dtype cast: the kernel
    # upcasts after load so bf16/fp16 inputs stream at native width.
    ms = jnp.squeeze(mix_short, axis=1)
    mm = jnp.squeeze(mix_middle, axis=1)
    ml = jnp.squeeze(mix_long, axis=1)
    tg = jnp.squeeze(target, axis=1)
    B, T = ms.shape

    # (B, T) -> (B, n_chunks, 128).  Free when T % 128 == 0; otherwise pad
    # only to the next 128 multiple (never to a time-tile multiple).
    n_chunks = pl.cdiv(T, LANE)
    t_pad = n_chunks * LANE

    def prep(x):
        if t_pad != T:
            x = jnp.pad(x, ((0, 0), (0, t_pad - T)))
        return x.reshape(B, n_chunks, LANE)

    ms3, mm3, ml3, tg3 = prep(ms), prep(mm), prep(ml), prep(tg)

    # Time tile: as large as useful, never rounded above n_chunks (no dead
    # DMA); a partial last tile is masked in-kernel instead.
    tc_tile = min(TC_TILE_TARGET, n_chunks)
    grid_t = pl.cdiv(n_chunks, tc_tile)
    need_mask = (n_chunks % tc_tile) != 0
    r8 = 8 if tc_tile % 8 == 0 else 1

    # Rows per grid step: amortize the ~0.35us/step overhead for short clips
    # while keeping the double-buffered f32 inputs <= ~12 MiB (v5e-safe) and
    # >= 2 row blocks so both v7x TensorCores get work when B >= 2.
    bm = min(B, MAX_ROWS_PER_STEP, max(1, STEP_CHUNK_BUDGET // tc_tile))
    if B >= 2:
        bm = max(1, min(bm, (B + 1) // 2))
    grid_rows = pl.cdiv(B, bm)
    grid = (grid_rows, grid_t)

    sig_spec = pl.BlockSpec((bm, tc_tile, LANE), lambda rb, ti: (rb, ti, 0))
    row_out_spec = pl.BlockSpec((bm, 1, LANE), lambda rb, ti: (rb, 0, 0))
    row_out_shape = jax.ShapeDtypeStruct((B, 1, LANE), jnp.float32)

    kern = functools.partial(
        _spex_kernel, with_ce=bool(is_train), t_len=float(T),
        n_chunks=int(n_chunks), tc_tile=int(tc_tile),
        need_mask=bool(need_mask))
    compiler_params = pltpu.CompilerParams(
        dimension_semantics=("parallel", "arbitrary"),
        vmem_limit_bytes=32 * 1024 * 1024)
    scratch = [pltpu.VMEM((N_STATS, bm, r8, LANE), jnp.float32)]

    sig_bytes = 4 * B * n_chunks * LANE * ms3.dtype.itemsize
    flops = 18 * B * n_chunks * LANE

    if is_train:
        C = speaker_logits.shape[-1]
        logits3 = speaker_logits.reshape(B, 1, C)
        # TODO(synk): speaker_id could live in SMEM via scalar prefetch; kept
        # as a tiny (bm,1,1) VMEM block so CE stays a vectorized iota-compare.
        sid3 = speaker_id.reshape(B, 1, 1).astype(jnp.int32)
        cost = pl.CostEstimate(
            flops=int(flops + 4 * B * C),
            transcendentals=int(B * (C + 16)),
            bytes_accessed=int(sig_bytes
                               + B * C * speaker_logits.dtype.itemsize
                               + B * 4 + 2 * B * LANE * 4))
        in_specs = [sig_spec] * 4 + [
            pl.BlockSpec((bm, 1, C), lambda rb, ti: (rb, 0, 0)),
            pl.BlockSpec((bm, 1, 1), lambda rb, ti: (rb, 0, 0)),
        ]
        w_rows, ce_rows = pl.pallas_call(
            kern,
            out_shape=(row_out_shape, row_out_shape),
            grid=grid,
            in_specs=in_specs,
            out_specs=(row_out_spec, row_out_spec),
            scratch_shapes=scratch,
            compiler_params=compiler_params,
            cost_estimate=cost,
        )(ms3, mm3, ml3, tg3, logits3, sid3)
        sisdr_loss = jnp.sum(w_rows[:, 0, 0]) / B
        ce_loss = jnp.sum(ce_rows[:, 0, 0]) / B
        return sisdr_loss + CE_SCALE * ce_loss

    # Eval path: no CE inputs, no CE compute, no CE DMA.
    cost = pl.CostEstimate(flops=int(flops), transcendentals=int(B * 16),
                           bytes_accessed=int(sig_bytes + B * LANE * 4))
    w_rows = pl.pallas_call(
        kern,
        out_shape=row_out_shape,
        grid=grid,
        in_specs=[sig_spec] * 4,
        out_specs=row_out_spec,
        scratch_shapes=scratch,
        compiler_params=compiler_params,
        cost_estimate=cost,
    )(ms3, mm3, ml3, tg3)
    return jnp.sum(w_rows[:, 0, 0]) / B


if __name__ == "__main__":
    key = jax.random.PRNGKey(0)
    B = 4             # batch
    T = 1024          # waveform length (T % 128 == 0 -> fully pad-free path)
    NUM_CLASSES = 32  # speaker classes

    k1, k2, k3, k4, k5, k6 = jax.random.split(key, 6)
    target = jax.random.normal(k1, (B, 1, T), dtype=jnp.float32)
    noise_s = 0.3 * jax.random.normal(k2, (B, 1, T), dtype=jnp.float32)
    noise_m = 0.3 * jax.random.normal(k3, (B, 1, T), dtype=jnp.float32)
    noise_l = 0.3 * jax.random.normal(k4, (B, 1, T), dtype=jnp.float32)
    mix_short = target + noise_s
    mix_middle = target + noise_m
    mix_long = target + noise_l
    speaker_logits = jax.random.normal(k5, (B, NUM_CLASSES), dtype=jnp.float32)
    speaker_id = jax.random.randint(k6, (B,), 0, NUM_CLASSES, dtype=jnp.int32)

    # train path (SI-SDR + CE) and eval path (SI-SDR only)
    loss_train = spex_plus_loss(True, mix_short, mix_middle, mix_long,
                                speaker_logits, speaker_id, target)
    loss_eval = spex_plus_loss(False, mix_short, mix_middle, mix_long,
                               speaker_logits, speaker_id, target)
    jax.block_until_ready((loss_train, loss_eval))
    print("KERNEL_OK")
</pallas_src>

<mosaic_0001>
module attributes {stable_mosaic.version = 11 : i64} {
  func.func @_spex_kernel(%arg0: i32, %arg1: i32, %arg2: memref<2x8x128xf32, #tpu.memory_space<vmem>>, %arg3: memref<2x8x128xf32, #tpu.memory_space<vmem>>, %arg4: memref<2x8x128xf32, #tpu.memory_space<vmem>>, %arg5: memref<2x8x128xf32, #tpu.memory_space<vmem>>, %arg6: memref<2x1x32xf32, #tpu.memory_space<vmem>>, %arg7: memref<2x1x1xi32, #tpu.memory_space<vmem>>, %arg8: memref<2x1x128xf32, #tpu.memory_space<vmem>>, %arg9: memref<2x1x128xf32, #tpu.memory_space<vmem>>, %arg10: memref<11x2x8x128xf32, #tpu.memory_space<vmem>>) attributes {dimension_semantics = [#tpu.dimension_semantics<parallel>, #tpu.dimension_semantics<arbitrary>], iteration_bounds = array<i64: 2, 1>, scalar_prefetch = 0 : i64, scratch_operands = 1 : i64, tpu.core_type = #tpu.core_type<tc>, window_params = [{transform_indices = @transform_0, window_bounds = array<i64: 2, 8, 128>}, {transform_indices = @transform_1, window_bounds = array<i64: 2, 8, 128>}, {transform_indices = @transform_2, window_bounds = array<i64: 2, 8, 128>}, {transform_indices = @transform_3, window_bounds = array<i64: 2, 8, 128>}, {transform_indices = @transform_4, window_bounds = array<i64: 2, 1, 32>}, {transform_indices = @transform_5, window_bounds = array<i64: 2, 1, 1>}, {transform_indices = @transform_6, window_bounds = array<i64: 2, 1, 128>}, {transform_indices = @transform_7, window_bounds = array<i64: 2, 1, 128>}]} {
    %c0 = arith.constant 0 : index
    %c0_0 = arith.constant 0 : index
    %c0_1 = arith.constant 0 : index
    %0 = vector.load %arg5[%c0, %c0_0, %c0_1] : memref<2x8x128xf32, #tpu.memory_space<vmem>>, vector<2x8x128xf32>
    %c0_2 = arith.constant 0 : index
    %c0_3 = arith.constant 0 : index
    %c0_4 = arith.constant 0 : index
    %1 = vector.load %arg2[%c0_2, %c0_3, %c0_4] : memref<2x8x128xf32, #tpu.memory_space<vmem>>, vector<2x8x128xf32>
    %c0_5 = arith.constant 0 : index
    %c0_6 = arith.constant 0 : index
    %c0_7 = arith.constant 0 : index
    %2 = vector.load %arg3[%c0_5, %c0_6, %c0_7] : memref<2x8x128xf32, #tpu.memory_space<vmem>>, vector<2x8x128xf32>
    %c0_8 = arith.constant 0 : index
    %c0_9 = arith.constant 0 : index
    %c0_10 = arith.constant 0 : index
    %3 = vector.load %arg4[%c0_8, %c0_9, %c0_10] : memref<2x8x128xf32, #tpu.memory_space<vmem>>, vector<2x8x128xf32>
    %c0_i32 = arith.constant 0 : i32
    %4 = arith.cmpi eq, %arg1, %c0_i32 : i32
    %5 = arith.extui %4 : i1 to i32
    %c0_i32_11 = arith.constant 0 : i32
    %6 = arith.cmpi ne, %5, %c0_i32_11 : i32
    scf.if %6 {
      %cst_102 = arith.constant 0.000000e+00 : f32
      %105 = vector.broadcast %cst_102 : f32 to vector<11x2x8x128xf32>
      %c0_103 = arith.constant 0 : index
      %c0_104 = arith.constant 0 : index
      %c0_105 = arith.constant 0 : index
      %c0_106 = arith.constant 0 : index
      %106 = vector.load %arg10[%c0_103, %c0_104, %c0_105, %c0_106] : memref<11x2x8x128xf32, #tpu.memory_space<vmem>>, vector<11x2x8x128xf32>
      tpu.vector_store %arg10[%c0_103, %c0_104, %c0_105, %c0_106], %105 {strides = array<i32>} : memref<11x2x8x128xf32, #tpu.memory_space<vmem>>, vector<11x2x8x128xf32>,
    } else {
    }
    %c0_12 = arith.constant 0 : index
    %c0_13 = arith.constant 0 : index
    %c0_14 = arith.constant 0 : index
    %c0_15 = arith.constant 0 : index
    %7 = vector.load %arg10[%c0_12, %c0_13, %c0_14, %c0_15] : memref<11x2x8x128xf32, #tpu.memory_space<vmem>>, vector<1x2x8x128xf32>
    %8 = vector.shape_cast %7 : vector<1x2x8x128xf32> to vector<2x8x128xf32>
    %9 = vector.shape_cast %0 : vector<2x8x128xf32> to vector<2x1x8x128xf32>
    %cst = arith.constant dense<0.000000e+00> : vector<2x8x128xf32>
    %10 = vector.multi_reduction <add>, %9, %cst [1] : vector<2x1x8x128xf32> to vector<2x8x128xf32>
    %11 = arith.addf %8, %10 : vector<2x8x128xf32>
    %c0_16 = arith.constant 0 : index
    %c0_17 = arith.constant 0 : index
    %c0_18 = arith.constant 0 : index
    %c0_19 = arith.constant 0 : index
    %12 = vector.load %arg10[%c0_16, %c0_17, %c0_18, %c0_19] : memref<11x2x8x128xf32, #tpu.memory_space<vmem>>, vector<1x2x8x128xf32>
    %13 = vector.shape_cast %12 : vector<1x2x8x128xf32> to vector<2x8x128xf32>
    %14 = vector.shape_cast %11 : vector<2x8x128xf32> to vector<1x2x8x128xf32>
    tpu.vector_store %arg10[%c0_16, %c0_17, %c0_18, %c0_19], %14 {strides = array<i32>} : memref<11x2x8x128xf32, #tpu.memory_space<vmem>>, vector<1x2x8x128xf32>,
    %c1 = arith.constant 1 : index
    %c0_20 = arith.constant 0 : index
    %c0_21 = arith.constant 0 : index
    %c0_22 = arith.constant 0 : index
    %15 = vector.load %arg10[%c1, %c0_20, %c0_21, %c0_22] : memref<11x2x8x128xf32, #tpu.memory_space<vmem>>, vector<1x2x8x128xf32>
    %16 = vector.shape_cast %15 : vector<1x2x8x128xf32> to vector<2x8x128xf32>
    %17 = arith.mulf %0, %0 : vector<2x8x128xf32>
    %18 = vector.shape_cast %17 : vector<2x8x128xf32> to vector<2x1x8x128xf32>
    %cst_23 = arith.constant dense<0.000000e+00> : vector<2x8x128xf32>
    %19 = vector.multi_reduction <add>, %18, %cst_23 [1] : vector<2x1x8x128xf32> to vector<2x8x128xf32>
    %20 = arith.addf %16, %19 : vector<2x8x128xf32>
    %c1_24 = arith.constant 1 : index
    %c0_25 = arith.constant 0 : index
    %c0_26 = arith.constant 0 : index
    %c0_27 = arith.constant 0 : index
    %21 = vector.load %arg10[%c1_24, %c0_25, %c0_26, %c0_27] : memref<11x2x8x128xf32, #tpu.memory_space<vmem>>, vector<1x2x8x128xf32>
    %22 = vector.shape_cast %21 : vector<1x2x8x128xf32> to vector<2x8x128xf32>
    %23 = vector.shape_cast %20 : vector<2x8x128xf32> to vector<1x2x8x128xf32>
    tpu.vector_store %arg10[%c1_24, %c0_25, %c0_26, %c0_27], %23 {strides = array<i32>} : memref<11x2x8x128xf32, #tpu.memory_space<vmem>>, vector<1x2x8x128xf32>,
    %c2 = arith.constant 2 : index
    %c0_28 = arith.constant 0 : index
    %c0_29 = arith.constant 0 : index
    %c0_30 = arith.constant 0 : index
    %24 = vector.load %arg10[%c2, %c0_28, %c0_29, %c0_30] : memref<11x2x8x128xf32, #tpu.memory_space<vmem>>, vector<1x2x8x128xf32>
    %25 = vector.shape_cast %24 : vector<1x2x8x128xf32> to vector<2x8x128xf32>
    %26 = vector.shape_cast %1 : vector<2x8x128xf32> to vector<2x1x8x128xf32>
    %cst_31 = arith.constant dense<0.000000e+00> : vector<2x8x128xf32>
    %27 = vector.multi_reduction <add>, %26, %cst_31 [1] : vector<2x1x8x128xf32> to vector<2x8x128xf32>
    %28 = arith.addf %25, %27 : vector<2x8x128xf32>
    %c2_32 = arith.constant 2 : index
    %c0_33 = arith.constant 0 : index
    %c0_34 = arith.constant 0 : index
    %c0_35 = arith.constant 0 : index
    %29 = vector.load %arg10[%c2_32, %c0_33, %c0_34, %c0_35] : memref<11x2x8x128xf32, #tpu.memory_space<vmem>>, vector<1x2x8x128xf32>
    %30 = vector.shape_cast %29 : vector<1x2x8x128xf32> to vector<2x8x128xf32>
    %31 = vector.shape_cast %28 : vector<2x8x128xf32> to vector<1x2x8x128xf32>
    tpu.vector_store %arg10[%c2_32, %c0_33, %c0_34, %c0_35], %31 {strides = array<i32>} : memref<11x2x8x128xf32, #tpu.memory_space<vmem>>, vector<1x2x8x128xf32>,
    %c3 = arith.constant 3 : index
    %c0_36 = arith.constant 0 : index
    %c0_37 = arith.constant 0 : index
    %c0_38 = arith.constant 0 : index
    %32 = vector.load %arg10[%c3, %c0_36, %c0_37, %c0_38] : memref<11x2x8x128xf32, #tpu.memory_space<vmem>>, vector<1x2x8x128xf32>
    %33 = vector.shape_cast %32 : vector<1x2x8x128xf32> to vector<2x8x128xf32>
    %34 = arith.mulf %1, %1 : vector<2x8x128xf32>
    %35 = vector.shape_cast %34 : vector<2x8x128xf32> to vector<2x1x8x128xf32>
    %cst_39 = arith.constant dense<0.000000e+00> : vector<2x8x128xf32>
    %36 = vector.multi_reduction <add>, %35, %cst_39 [1] : vector<2x1x8x128xf32> to vector<2x8x128xf32>
    %37 = arith.addf %33, %36 : vector<2x8x128xf32>
    %c3_40 = arith.constant 3 : index
    %c0_41 = arith.constant 0 : index
    %c0_42 = arith.constant 0 : index
    %c0_43 = arith.constant 0 : index
    %38 = vector.load %arg10[%c3_40, %c0_41, %c0_42, %c0_43] : memref<11x2x8x128xf32, #tpu.memory_space<vmem>>, vector<1x2x8x128xf32>
    %39 = vector.shape_cast %38 : vector<1x2x8x128xf32> to vector<2x8x128xf32>
    %40 = vector.shape_cast %37 : vector<2x8x128xf32> to vector<1x2x8x128xf32>
    tpu.vector_store %arg10[%c3_40, %c0_41, %c0_42, %c0_43], %40 {strides = array<i32>} : memref<11x2x8x128xf32, #tpu.memory_space<vmem>>, vector<1x2x8x128xf32>,
    %c4 = arith.constant 4 : index
    %c0_44 = arith.constant 0 : index
    %c0_45 = arith.constant 0 : index
    %c0_46 = arith.constant 0 : index
    %41 = vector.load %arg10[%c4, %c0_44, %c0_45, %c0_46] : memref<11x2x8x128xf32, #tpu.memory_space<vmem>>, vector<1x2x8x128xf32>
    %42 = vector.shape_cast %41 : vector<1x2x8x128xf32> to vector<2x8x128xf32>
    %43 = arith.mulf %1, %0 : vector<2x8x128xf32>
    %44 = vector.shape_cast %43 : vector<2x8x128xf32> to vector<2x1x8x128xf32>
    %cst_47 = arith.constant dense<0.000000e+00> : vector<2x8x128xf32>
    %45 = vector.multi_reduction <add>, %44, %cst_47 [1] : vector<2x1x8x128xf32> to vector<2x8x128xf32>
    %46 = arith.addf %42, %45 : vector<2x8x128xf32>
    %c4_48 = arith.constant 4 : index
    %c0_49 = arith.constant 0 : index
    %c0_50 = arith.constant 0 : index
    %c0_51 = arith.constant 0 : index
    %47 = vector.load %arg10[%c4_48, %c0_49, %c0_50, %c0_51] : memref<11x2x8x128xf32, #tpu.memory_space<vmem>>, vector<1x2x8x128xf32>
    %48 = vector.shape_cast %47 : vector<1x2x8x128xf32> to vector<2x8x128xf32>
    %49 = vector.shape_cast %46 : vector<2x8x128xf32> to vector<1x2x8x128xf32>
    tpu.vector_store %arg10[%c4_48, %c0_49, %c0_50, %c0_51], %49 {strides = array<i32>} : memref<11x2x8x128xf32, #tpu.memory_space<vmem>>, vector<1x2x8x128xf32>,
    %c5 = arith.constant 5 : index
    %c0_52 = arith.constant 0 : index
    %c0_53 = arith.constant 0 : index
    %c0_54 = arith.constant 0 : index
    %50 = vector.load %arg10[%c5, %c0_52, %c0_53, %c0_54] : memref<11x2x8x128xf32, #tpu.memory_space<vmem>>, vector<1x2x8x128xf32>
    %51 = vector.shape_cast %50 : vector<1x2x8x128xf32> to vector<2x8x128xf32>
    %52 = vector.shape_cast %2 : vector<2x8x128xf32> to vector<2x1x8x128xf32>
    %cst_55 = arith.constant dense<0.000000e+00> : vector<2x8x128xf32>
    %53 = vector.multi_reduction <add>, %52, %cst_55 [1] : vector<2x1x8x128xf32> to vector<2x8x128xf32>
    %54 = arith.addf %51, %53 : vector<2x8x128xf32>
    %c5_56 = arith.constant 5 : index
    %c0_57 = arith.constant 0 : index
    %c0_58 = arith.constant 0 : index
    %c0_59 = arith.constant 0 : index
    %55 = vector.load %arg10[%c5_56, %c0_57, %c0_58, %c0_59] : memref<11x2x8x128xf32, #tpu.memory_space<vmem>>, vector<1x2x8x128xf32>
    %56 = vector.shape_cast %55 : vector<1x2x8x128xf32> to vector<2x8x128xf32>
    %57 = vector.shape_cast %54 : vector<2x8x128xf32> to vector<1x2x8x128xf32>
    tpu.vector_store %arg10[%c5_56, %c0_57, %c0_58, %c0_59], %57 {strides = array<i32>} : memref<11x2x8x128xf32, #tpu.memory_space<vmem>>, vector<1x2x8x128xf32>,
    %c6 = arith.constant 6 : index
    %c0_60 = arith.constant 0 : index
    %c0_61 = arith.constant 0 : index
    %c0_62 = arith.constant 0 : index
    %58 = vector.load %arg10[%c6, %c0_60, %c0_61, %c0_62] : memref<11x2x8x128xf32, #tpu.memory_space<vmem>>, vector<1x2x8x128xf32>
    %59 = vector.shape_cast %58 : vector<1x2x8x128xf32> to vector<2x8x128xf32>
    %60 = arith.mulf %2, %2 : vector<2x8x128xf32>
    %61 = vector.shape_cast %60 : vector<2x8x128xf32> to vector<2x1x8x128xf32>
    %cst_63 = arith.constant dense<0.000000e+00> : vector<2x8x128xf32>
    %62 = vector.multi_reduction <add>, %61, %cst_63 [1] : vector<2x1x8x128xf32> to vector<2x8x128xf32>
    %63 = arith.addf %59, %62 : vector<2x8x128xf32>
    %c6_64 = arith.constant 6 : index
    %c0_65 = arith.constant 0 : index
    %c0_66 = arith.constant 0 : index
    %c0_67 = arith.constant 0 : index
    %64 = vector.load %arg10[%c6_64, %c0_65, %c0_66, %c0_67] : memref<11x2x8x128xf32, #tpu.memory_space<vmem>>, vector<1x2x8x128xf32>
    %65 = vector.shape_cast %64 : vector<1x2x8x128xf32> to vector<2x8x128xf32>
    %66 = vector.shape_cast %63 : vector<2x8x128xf32> to vector<1x2x8x128xf32>
    tpu.vector_store %arg10[%c6_64, %c0_65, %c0_66, %c0_67], %66 {strides = array<i32>} : memref<11x2x8x128xf32, #tpu.memory_space<vmem>>, vector<1x2x8x128xf32>,
    %c7 = arith.constant 7 : index
    %c0_68 = arith.constant 0 : index
    %c0_69 = arith.constant 0 : index
    %c0_70 = arith.constant 0 : index
    %67 = vector.load %arg10[%c7, %c0_68, %c0_69, %c0_70] : memref<11x2x8x128xf32, #tpu.memory_space<vmem>>, vector<1x2x8x128xf32>
    %68 = vector.shape_cast %67 : vector<1x2x8x128xf32> to vector<2x8x128xf32>
    %69 = arith.mulf %2, %0 : vector<2x8x128xf32>
    %70 = vector.shape_cast %69 : vector<2x8x128xf32> to vector<2x1x8x128xf32>
    %cst_71 = arith.constant dense<0.000000e+00> : vector<2x8x128xf32>
    %71 = vector.multi_reduction <add>, %70, %cst_71 [1] : vector<2x1x8x128xf32> to vector<2x8x128xf32>
    %72 = arith.addf %68, %71 : vector<2x8x128xf32>
    %c7_72 = arith.constant 7 : index
    %c0_73 = arith.constant 0 : index
    %c0_74 = arith.constant 0 : index
    %c0_75 = arith.constant 0 : index
    %73 = vector.load %arg10[%c7_72, %c0_73, %c0_74, %c0_75] : memref<11x2x8x128xf32, #tpu.memory_space<vmem>>, vector<1x2x8x128xf32>
    %74 = vector.shape_cast %73 : vector<1x2x8x128xf32> to vector<2x8x128xf32>
    %75 = vector.shape_cast %72 : vector<2x8x128xf32> to vector<1x2x8x128xf32>
    tpu.vector_store %arg10[%c7_72, %c0_73, %c0_74, %c0_75], %75 {strides = array<i32>} : memref<11x2x8x128xf32, #tpu.memory_space<vmem>>, vector<1x2x8x128xf32>,
    %c8 = arith.constant 8 : index
    %c0_76 = arith.constant 0 : index
    %c0_77 = arith.constant 0 : index
    %c0_78 = arith.constant 0 : index
    %76 = vector.load %arg10[%c8, %c0_76, %c0_77, %c0_78] : memref<11x2x8x128xf32, #tpu.memory_space<vmem>>, vector<1x2x8x128xf32>
    %77 = vector.shape_cast %76 : vector<1x2x8x128xf32> to vector<2x8x128xf32>
    %78 = vector.shape_cast %3 : vector<2x8x128xf32> to vector<2x1x8x128xf32>
    %cst_79 = arith.constant dense<0.000000e+00> : vector<2x8x128xf32>
    %79 = vector.multi_reduction <add>, %78, %cst_79 [1] : vector<2x1x8x128xf32> to vector<2x8x128xf32>
    %80 = arith.addf %77, %79 : vector<2x8x128xf32>
    %c8_80 = arith.constant 8 : index
    %c0_81 = arith.constant 0 : index
    %c0_82 = arith.constant 0 : index
    %c0_83 = arith.constant 0 : index
    %81 = vector.load %arg10[%c8_80, %c0_81, %c0_82, %c0_83] : memref<11x2x8x128xf32, #tpu.memory_space<vmem>>, vector<1x2x8x128xf32>
    %82 = vector.shape_cast %81 : vector<1x2x8x128xf32> to vector<2x8x128xf32>
    %83 = vector.shape_cast %80 : vector<2x8x128xf32> to vector<1x2x8x128xf32>
    tpu.vector_store %arg10[%c8_80, %c0_81, %c0_82, %c0_83], %83 {strides = array<i32>} : memref<11x2x8x128xf32, #tpu.memory_space<vmem>>, vector<1x2x8x128xf32>,
    %c9 = arith.constant 9 : index
    %c0_84 = arith.constant 0 : index
    %c0_85 = arith.constant 0 : index
    %c0_86 = arith.constant 0 : index
    %84 = vector.load %arg10[%c9, %c0_84, %c0_85, %c0_86] : memref<11x2x8x128xf32, #tpu.memory_space<vmem>>, vector<1x2x8x128xf32>
    %85 = vector.shape_cast %84 : vector<1x2x8x128xf32> to vector<2x8x128xf32>
    %86 = arith.mulf %3, %3 : vector<2x8x128xf32>
    %87 = vector.shape_cast %86 : vector<2x8x128xf32> to vector<2x1x8x128xf32>
    %cst_87 = arith.constant dense<0.000000e+00> : vector<2x8x128xf32>
    %88 = vector.multi_reduction <add>, %87, %cst_87 [1] : vector<2x1x8x128xf32> to vector<2x8x128xf32>
    %89 = arith.addf %85, %88 : vector<2x8x128xf32>
    %c9_88 = arith.constant 9 : index
    %c0_89 = arith.constant 0 : index
    %c0_90 = arith.constant 0 : index
    %c0_91 = arith.constant 0 : index
    %90 = vector.load %arg10[%c9_88, %c0_89, %c0_90, %c0_91] : memref<11x2x8x128xf32, #tpu.memory_space<vmem>>, vector<1x2x8x128xf32>
    %91 = vector.shape_cast %90 : vector<1x2x8x128xf32> to vector<2x8x128xf32>
    %92 = vector.shape_cast %89 : vector<2x8x128xf32> to vector<1x2x8x128xf32>
    tpu.vector_store %arg10[%c9_88, %c0_89, %c0_90, %c0_91], %92 {strides = array<i32>} : memref<11x2x8x128xf32, #tpu.memory_space<vmem>>, vector<1x2x8x128xf32>,
    %c10 = arith.constant 10 : index
    %c0_92 = arith.constant 0 : index
    %c0_93 = arith.constant 0 : index
    %c0_94 = arith.constant 0 : index
    %93 = vector.load %arg10[%c10, %c0_92, %c0_93, %c0_94] : memref<11x2x8x128xf32, #tpu.memory_space<vmem>>, vector<1x2x8x128xf32>
    %94 = vector.shape_cast %93 : vector<1x2x8x128xf32> to vector<2x8x128xf32>
    %95 = arith.mulf %3, %0 : vector<2x8x128xf32>
    %96 = vector.shape_cast %95 : vector<2x8x128xf32> to vector<2x1x8x128xf32>
    %cst_95 = arith.constant dense<0.000000e+00> : vector<2x8x128xf32>
    %97 = vector.multi_reduction <add>, %96, %cst_95 [1] : vector<2x1x8x128xf32> to vector<2x8x128xf32>
    %98 = arith.addf %94, %97 : vector<2x8x128xf32>
    %c10_96 = arith.constant 10 : index
    %c0_97 = arith.constant 0 : index
    %c0_98 = arith.constant 0 : index
    %c0_99 = arith.constant 0 : index
    %99 = vector.load %arg10[%c10_96, %c0_97, %c0_98, %c0_99] : memref<11x2x8x128xf32, #tpu.memory_space<vmem>>, vector<1x2x8x128xf32>
    %100 = vector.shape_cast %99 : vector<1x2x8x128xf32> to vector<2x8x128xf32>
    %101 = vector.shape_cast %98 : vector<2x8x128xf32> to vector<1x2x8x128xf32>
    tpu.vector_store %arg10[%c10_96, %c0_97, %c0_98, %c0_99], %101 {strides = array<i32>} : memref<11x2x8x128xf32, #tpu.memory_space<vmem>>, vector<1x2x8x128xf32>,
    %c0_i32_100 = arith.constant 0 : i32
    %102 = arith.cmpi eq, %arg1, %c0_i32_100 : i32
    %103 = arith.extui %102 : i1 to i32
    %c0_i32_101 = arith.constant 0 : i32
    %104 = arith.cmpi ne, %103, %c0_i32_101 : i32
    scf.if %104 {
      %c0_102 = arith.constant 0 : index
      %c0_103 = arith.constant 0 : index
      %c0_104 = arith.constant 0 : index
      %c0_105 = arith.constant 0 : index
      %105 = vector.load %arg10[%c0_102, %c0_103, %c0_104, %c0_105] : memref<11x2x8x128xf32, #tpu.memory_space<vmem>>, vector<11x2x8x128xf32>
      %cst_106 = arith.constant dense<0.000000e+00> : vector<11x2x8xf32>
      %106 = vector.multi_reduction <add>, %105, %cst_106 [3] : vector<11x2x8x128xf32> to vector<11x2x8xf32>
      %107 = vector.shape_cast %106 : vector<11x2x8xf32> to vector<11x2x8x1xf32>
      %cst_107 = arith.constant dense<0.000000e+00> : vector<11x2x1xf32>
      %108 = vector.multi_reduction <add>, %107, %cst_107 [2] : vector<11x2x8x1xf32> to vector<11x2x1xf32>
      %109 = vector.shape_cast %108 : vector<11x2x1xf32> to vector<11x2x1x1xf32>
      %110 = vector.extract_strided_slice %109 {offsets = [0, 0, 0, 0], sizes = [1, 2, 1, 1], strides = [1, 1, 1, 1]} : vector<11x2x1x1xf32> to vector<1x2x1x1xf32>
      %111 = vector.shape_cast %110 : vector<1x2x1x1xf32> to vector<2x1x1xf32>
      %112 = vector.extract_strided_slice %109 {offsets = [1, 0, 0, 0], sizes = [1, 2, 1, 1], strides = [1, 1, 1, 1]} : vector<11x2x1x1xf32> to vector<1x2x1x1xf32>
      %113 = vector.shape_cast %112 : vector<1x2x1x1xf32> to vector<2x1x1xf32>
      %114 = arith.mulf %111, %111 : vector<2x1x1xf32>
      %cst_108 = arith.constant 1.024000e+03 : f32
      %115 = vector.broadcast %cst_108 : f32 to vector<2x1x1xf32>
      %116 = arith.divf %114, %115 : vector<2x1x1xf32>
      %117 = arith.subf %113, %116 : vector<2x1x1xf32>
      %118 = vector.extract_strided_slice %109 {offsets = [2, 0, 0, 0], sizes = [1, 2, 1, 1], strides = [1, 1, 1, 1]} : vector<11x2x1x1xf32> to vector<1x2x1x1xf32>
      %119 = vector.shape_cast %118 : vector<1x2x1x1xf32> to vector<2x1x1xf32>
      %120 = vector.extract_strided_slice %109 {offsets = [3, 0, 0, 0], sizes = [1, 2, 1, 1], strides = [1, 1, 1, 1]} : vector<11x2x1x1xf32> to vector<1x2x1x1xf32>
      %121 = vector.shape_cast %120 : vector<1x2x1x1xf32> to vector<2x1x1xf32>
      %122 = vector.extract_strided_slice %109 {offsets = [4, 0, 0, 0], sizes = [1, 2, 1, 1], strides = [1, 1, 1, 1]} : vector<11x2x1x1xf32> to vector<1x2x1x1xf32>
      %123 = vector.shape_cast %122 : vector<1x2x1x1xf32> to vector<2x1x1xf32>
      %124 = arith.mulf %119, %111 : vector<2x1x1xf32>
      %cst_109 = arith.constant 1.024000e+03 : f32
      %125 = vector.broadcast %cst_109 : f32 to vector<2x1x1xf32>
      %126 = arith.divf %124, %125 : vector<2x1x1xf32>
      %127 = arith.subf %123, %126 : vector<2x1x1xf32>
      %128 = arith.mulf %119, %119 : vector<2x1x1xf32>
      %cst_110 = arith.constant 1.024000e+03 : f32
      %129 = vector.broadcast %cst_110 : f32 to vector<2x1x1xf32>
      %130 = arith.divf %128, %129 : vector<2x1x1xf32>
      %131 = arith.subf %121, %130 : vector<2x1x1xf32>
      %cst_111 = arith.constant 9.99999997E-7 : f32
      %132 = vector.broadcast %cst_111 : f32 to vector<2x1x1xf32>
      %133 = arith.addf %117, %132 : vector<2x1x1xf32>
      %134 = arith.divf %127, %133 : vector<2x1x1xf32>
      %135 = arith.mulf %134, %134 : vector<2x1x1xf32>
      %136 = arith.mulf %135, %117 : vector<2x1x1xf32>
      %cst_112 = arith.constant 0.000000e+00 : f32
      %137 = vector.broadcast %cst_112 : f32 to vector<2x1x1xf32>
      %138 = arith.maximumf %136, %137 : vector<2x1x1xf32>
      %cst_113 = arith.constant 2.000000e+00 : f32
      %139 = vector.broadcast %cst_113 : f32 to vector<2x1x1xf32>
      %140 = arith.mulf %139, %134 : vector<2x1x1xf32>
      %141 = arith.mulf %140, %127 : vector<2x1x1xf32>
      %142 = arith.subf %138, %141 : vector<2x1x1xf32>
      %143 = arith.addf %142, %131 : vector<2x1x1xf32>
      %cst_114 = arith.constant 0.000000e+00 : f32
      %144 = vector.broadcast %cst_114 : f32 to vector<2x1x1xf32>
      %145 = arith.maximumf %143, %144 : vector<2x1x1xf32>
      %146 = math.sqrt %138 : vector<2x1x1xf32>
      %147 = math.sqrt %145 : vector<2x1x1xf32>
      %cst_115 = arith.constant 9.99999997E-7 : f32
      %148 = vector.broadcast %cst_115 : f32 to vector<2x1x1xf32>
      %149 = arith.addf %147, %148 : vector<2x1x1xf32>
      %150 = arith.divf %146, %149 : vector<2x1x1xf32>
      %cst_116 = arith.constant 9.99999997E-7 : f32
      %151 = vector.broadcast %cst_116 : f32 to vector<2x1x1xf32>
      %152 = arith.addf %150, %151 : vector<2x1x1xf32>
      %153 = math.log %152 : vector<2x1x1xf32>
      %cst_117 = arith.constant 8.68588924 : f32
      %154 = vector.broadcast %cst_117 : f32 to vector<2x1x1xf32>
      %155 = arith.mulf %154, %153 : vector<2x1x1xf32>
      %156 = vector.extract_strided_slice %109 {offsets = [5, 0, 0, 0], sizes = [1, 2, 1, 1], strides = [1, 1, 1, 1]} : vector<11x2x1x1xf32> to vector<1x2x1x1xf32>
      %157 = vector.shape_cast %156 : vector<1x2x1x1xf32> to vector<2x1x1xf32>
      %158 = vector.extract_strided_slice %109 {offsets = [6, 0, 0, 0], sizes = [1, 2, 1, 1], strides = [1, 1, 1, 1]} : vector<11x2x1x1xf32> to vector<1x2x1x1xf32>
      %159 = vector.shape_cast %158 : vector<1x2x1x1xf32> to vector<2x1x1xf32>
      %160 = vector.extract_strided_slice %109 {offsets = [7, 0, 0, 0], sizes = [1, 2, 1, 1], strides = [1, 1, 1, 1]} : vector<11x2x1x1xf32> to vector<1x2x1x1xf32>
      %161 = vector.shape_cast %160 : vector<1x2x1x1xf32> to vector<2x1x1xf32>
      %162 = arith.mulf %157, %111 : vector<2x1x1xf32>
      %cst_118 = arith.constant 1.024000e+03 : f32
      %163 = vector.broadcast %cst_118 : f32 to vector<2x1x1xf32>
      %164 = arith.divf %162, %163 : vector<2x1x1xf32>
      %165 = arith.subf %161, %164 : vector<2x1x1xf32>
      %166 = arith.mulf %157, %157 : vector<2x1x1xf32>
      %cst_119 = arith.constant 1.024000e+03 : f32
      %167 = vector.broadcast %cst_119 : f32 to vector<2x1x1xf32>
      %168 = arith.divf %166, %167 : vector<2x1x1xf32>
      %169 = arith.subf %159, %168 : vector<2x1x1xf32>
      %cst_120 = arith.constant 9.99999997E-7 : f32
      %170 = vector.broadcast %cst_120 : f32 to vector<2x1x1xf32>
      %171 = arith.addf %117, %170 : vector<2x1x1xf32>
      %172 = arith.divf %165, %171 : vector<2x1x1xf32>
      %173 = arith.mulf %172, %172 : vector<2x1x1xf32>
      %174 = arith.mulf %173, %117 : vector<2x1x1xf32>
      %cst_121 = arith.constant 0.000000e+00 : f32
      %175 = vector.broadcast %cst_121 : f32 to vector<2x1x1xf32>
      %176 = arith.maximumf %174, %175 : vector<2x1x1xf32>
      %cst_122 = arith.constant 2.000000e+00 : f32
      %177 = vector.broadcast %cst_122 : f32 to vector<2x1x1xf32>
      %178 = arith.mulf %177, %172 : vector<2x1x1xf32>
      %179 = arith.mulf %178, %165 : vector<2x1x1xf32>
      %180 = arith.subf %176, %179 : vector<2x1x1xf32>
      %181 = arith.addf %180, %169 : vector<2x1x1xf32>
      %cst_123 = arith.constant 0.000000e+00 : f32
      %182 = vector.broadcast %cst_123 : f32 to vector<2x1x1xf32>
      %183 = arith.maximumf %181, %182 : vector<2x1x1xf32>
      %184 = math.sqrt %176 : vector<2x1x1xf32>
      %185 = math.sqrt %183 : vector<2x1x1xf32>
      %cst_124 = arith.constant 9.99999997E-7 : f32
      %186 = vector.broadcast %cst_124 : f32 to vector<2x1x1xf32>
      %187 = arith.addf %185, %186 : vector<2x1x1xf32>
      %188 = arith.divf %184, %187 : vector<2x1x1xf32>
      %cst_125 = arith.constant 9.99999997E-7 : f32
      %189 = vector.broadcast %cst_125 : f32 to vector<2x1x1xf32>
      %190 = arith.addf %188, %189 : vector<2x1x1xf32>
      %191 = math.log %190 : vector<2x1x1xf32>
      %cst_126 = arith.constant 8.68588924 : f32
      %192 = vector.broadcast %cst_126 : f32 to vector<2x1x1xf32>
      %193 = arith.mulf %192, %191 : vector<2x1x1xf32>
      %194 = vector.extract_strided_slice %109 {offsets = [8, 0, 0, 0], sizes = [1, 2, 1, 1], strides = [1, 1, 1, 1]} : vector<11x2x1x1xf32> to vector<1x2x1x1xf32>
      %195 = vector.shape_cast %194 : vector<1x2x1x1xf32> to vector<2x1x1xf32>
      %196 = vector.extract_strided_slice %109 {offsets = [9, 0, 0, 0], sizes = [1, 2, 1, 1], strides = [1, 1, 1, 1]} : vector<11x2x1x1xf32> to vector<1x2x1x1xf32>
      %197 = vector.shape_cast %196 : vector<1x2x1x1xf32> to vector<2x1x1xf32>
      %198 = vector.extract_strided_slice %109 {offsets = [10, 0, 0, 0], sizes = [1, 2, 1, 1], strides = [1, 1, 1, 1]} : vector<11x2x1x1xf32> to vector<1x2x1x1xf32>
      %199 = vector.shape_cast %198 : vector<1x2x1x1xf32> to vector<2x1x1xf32>
      %200 = arith.mulf %195, %111 : vector<2x1x1xf32>
      %cst_127 = arith.constant 1.024000e+03 : f32
      %201 = vector.broadcast %cst_127 : f32 to vector<2x1x1xf32>
      %202 = arith.divf %200, %201 : vector<2x1x1xf32>
      %203 = arith.subf %199, %202 : vector<2x1x1xf32>
      %204 = arith.mulf %195, %195 : vector<2x1x1xf32>
      %cst_128 = arith.constant 1.024000e+03 : f32
      %205 = vector.broadcast %cst_128 : f32 to vector<2x1x1xf32>
      %206 = arith.divf %204, %205 : vector<2x1x1xf32>
      %207 = arith.subf %197, %206 : vector<2x1x1xf32>
      %cst_129 = arith.constant 9.99999997E-7 : f32
      %208 = vector.broadcast %cst_129 : f32 to vector<2x1x1xf32>
      %209 = arith.addf %117, %208 : vector<2x1x1xf32>
      %210 = arith.divf %203, %209 : vector<2x1x1xf32>
      %211 = arith.mulf %210, %210 : vector<2x1x1xf32>
      %212 = arith.mulf %211, %117 : vector<2x1x1xf32>
      %cst_130 = arith.constant 0.000000e+00 : f32
      %213 = vector.broadcast %cst_130 : f32 to vector<2x1x1xf32>
      %214 = arith.maximumf %212, %213 : vector<2x1x1xf32>
      %cst_131 = arith.constant 2.000000e+00 : f32
      %215 = vector.broadcast %cst_131 : f32 to vector<2x1x1xf32>
      %216 = arith.mulf %215, %210 : vector<2x1x1xf32>
      %217 = arith.mulf %216, %203 : vector<2x1x1xf32>
      %218 = arith.subf %214, %217 : vector<2x1x1xf32>
      %219 = arith.addf %218, %207 : vector<2x1x1xf32>
      %cst_132 = arith.constant 0.000000e+00 : f32
      %220 = vector.broadcast %cst_132 : f32 to vector<2x1x1xf32>
      %221 = arith.maximumf %219, %220 : vector<2x1x1xf32>
      %222 = math.sqrt %214 : vector<2x1x1xf32>
      %223 = math.sqrt %221 : vector<2x1x1xf32>
      %cst_133 = arith.constant 9.99999997E-7 : f32
      %224 = vector.broadcast %cst_133 : f32 to vector<2x1x1xf32>
      %225 = arith.addf %223, %224 : vector<2x1x1xf32>
      %226 = arith.divf %222, %225 : vector<2x1x1xf32>
      %cst_134 = arith.constant 9.99999997E-7 : f32
      %227 = vector.broadcast %cst_134 : f32 to vector<2x1x1xf32>
      %228 = arith.addf %226, %227 : vector<2x1x1xf32>
      %229 = math.log %228 : vector<2x1x1xf32>
      %cst_135 = arith.constant 8.68588924 : f32
      %230 = vector.broadcast %cst_135 : f32 to vector<2x1x1xf32>
      %231 = arith.mulf %230, %229 : vector<2x1x1xf32>
      %cst_136 = arith.constant 8.000000e-01 : f32
      %232 = vector.broadcast %cst_136 : f32 to vector<2x1x1xf32>
      %233 = arith.mulf %232, %155 : vector<2x1x1xf32>
      %cst_137 = arith.constant 1.000000e-01 : f32
      %234 = vector.broadcast %cst_137 : f32 to vector<2x1x1xf32>
      %235 = arith.mulf %234, %193 : vector<2x1x1xf32>
      %236 = arith.addf %233, %235 : vector<2x1x1xf32>
      %cst_138 = arith.constant 1.000000e-01 : f32
      %237 = vector.broadcast %cst_138 : f32 to vector<2x1x1xf32>
      %238 = arith.mulf %237, %231 : vector<2x1x1xf32>
      %239 = arith.addf %236, %238 : vector<2x1x1xf32>
      %cst_139 = arith.constant 0.000000e+00 : f32
      %240 = vector.broadcast %cst_139 : f32 to vector<2x1x1xf32>
      %241 = arith.subf %240, %239 : vector<2x1x1xf32>
      %242 = vector.shape_cast %241 : vector<2x1x1xf32> to vector<2x1x1xf32>
      %243 = vector.broadcast %242 : vector<2x1x1xf32> to vector<2x1x128xf32>
      %c0_140 = arith.constant 0 : index
      %c0_141 = arith.constant 0 : index
      %c0_142 = arith.constant 0 : index
      %244 = vector.load %arg8[%c0_140, %c0_141, %c0_142] : memref<2x1x128xf32, #tpu.memory_space<vmem>>, vector<2x1x128xf32>
      tpu.vector_store %arg8[%c0_140, %c0_141, %c0_142], %243 {strides = array<i32>} : memref<2x1x128xf32, #tpu.memory_space<vmem>>, vector<2x1x128xf32>,
      %c0_143 = arith.constant 0 : index
      %c0_144 = arith.constant 0 : index
      %c0_145 = arith.constant 0 : index
      %245 = vector.load %arg6[%c0_143, %c0_144, %c0_145] : memref<2x1x32xf32, #tpu.memory_space<vmem>>, vector<2x1x32xf32>
      %c0_146 = arith.constant 0 : index
      %c0_147 = arith.constant 0 : index
      %c0_148 = arith.constant 0 : index
      %246 = vector.load %arg7[%c0_146, %c0_147, %c0_148] : memref<2x1x1xi32, #tpu.memory_space<vmem>>, vector<2x1x1xi32>
      %247 = tpu.iota {dimensions = array<i32: 2>} : vector<2x1x32xi32>
      %248 = vector.broadcast %246 : vector<2x1x1xi32> to vector<2x1x32xi32>
      %249 = arith.cmpi eq, %247, %248 : vector<2x1x32xi32>
      %cst_149 = arith.constant 0.000000e+00 : f32
      %250 = vector.broadcast %cst_149 : f32 to vector<2x1x32xf32>
      %251 = arith.select %249, %245, %250 : vector<2x1x32xi1>, vector<2x1x32xf32>
      %cst_150 = arith.constant dense<0.000000e+00> : vector<2x1xf32>
      %252 = vector.multi_reduction <add>, %251, %cst_150 [2] : vector<2x1x32xf32> to vector<2x1xf32>
      %253 = vector.shape_cast %252 : vector<2x1xf32> to vector<2x1x1xf32>
      %cst_151 = arith.constant dense<0xFF800000> : vector<2x1xf32>
      %254 = vector.multi_reduction <maximumf>, %245, %cst_151 [2] : vector<2x1x32xf32> to vector<2x1xf32>
      %255 = vector.shape_cast %254 : vector<2x1xf32> to vector<2x1x1xf32>
      %256 = vector.broadcast %255 : vector<2x1x1xf32> to vector<2x1x32xf32>
      %257 = arith.subf %245, %256 : vector<2x1x32xf32>
      %258 = math.exp %257 : vector<2x1x32xf32>
      %cst_152 = arith.constant dense<0.000000e+00> : vector<2x1xf32>
      %259 = vector.multi_reduction <add>, %258, %cst_152 [2] : vector<2x1x32xf32> to vector<2x1xf32>
      %260 = vector.shape_cast %259 : vector<2x1xf32> to vector<2x1x1xf32>
      %261 = math.log %260 : vector<2x1x1xf32>
      %262 = arith.addf %255, %261 : vector<2x1x1xf32>
      %263 = arith.subf %262, %253 : vector<2x1x1xf32>
      %264 = vector.shape_cast %263 : vector<2x1x1xf32> to vector<2x1x1xf32>
      %265 = vector.broadcast %264 : vector<2x1x1xf32> to vector<2x1x128xf32>
      %c0_153 = arith.constant 0 : index
      %c0_154 = arith.constant 0 : index
      %c0_155 = arith.constant 0 : index
      %266 = vector.load %arg9[%c0_153, %c0_154, %c0_155] : memref<2x1x128xf32, #tpu.memory_space<vmem>>, vector<2x1x128xf32>
      tpu.vector_store %arg9[%c0_153, %c0_154, %c0_155], %265 {strides = array<i32>} : memref<2x1x128xf32, #tpu.memory_space<vmem>>, vector<2x1x128xf32>,
    } else {
    }
    return
  }
  func.func @transform_0(%arg0: i32, %arg1: i32) -> (i32, i32, i32) {
    %c0_i32 = arith.constant 0 : i32
    %c0_i32_0 = arith.constant 0 : i32
    return %arg0, %arg1, %c0_i32 : i32, i32, i32
  }
  func.func @transform_1(%arg0: i32, %arg1: i32) -> (i32, i32, i32) {
    %c0_i32 = arith.constant 0 : i32
    %c0_i32_0 = arith.constant 0 : i32
    return %arg0, %arg1, %c0_i32 : i32, i32, i32
  }
  func.func @transform_2(%arg0: i32, %arg1: i32) -> (i32, i32, i32) {
    %c0_i32 = arith.constant 0 : i32
    %c0_i32_0 = arith.constant 0 : i32
    return %arg0, %arg1, %c0_i32 : i32, i32, i32
  }
  func.func @transform_3(%arg0: i32, %arg1: i32) -> (i32, i32, i32) {
    %c0_i32 = arith.constant 0 : i32
    %c0_i32_0 = arith.constant 0 : i32
    return %arg0, %arg1, %c0_i32 : i32, i32, i32
  }
  func.func @transform_4(%arg0: i32, %arg1: i32) -> (i32, i32, i32) {
    %c0_i32 = arith.constant 0 : i32
    %c0_i32_0 = arith.constant 0 : i32
    %c0_i32_1 = arith.constant 0 : i32
    return %arg0, %c0_i32, %c0_i32_0 : i32, i32, i32
  }
  func.func @transform_5(%arg0: i32, %arg1: i32) -> (i32, i32, i32) {
    %c0_i32 = arith.constant 0 : i32
    %c0_i32_0 = arith.constant 0 : i32
    %c0_i32_1 = arith.constant 0 : i32
    return %arg0, %c0_i32, %c0_i32_0 : i32, i32, i32
  }
  func.func @transform_6(%arg0: i32, %arg1: i32) -> (i32, i32, i32) {
    %c0_i32 = arith.constant 0 : i32
    %c0_i32_0 = arith.constant 0 : i32
    %c0_i32_1 = arith.constant 0 : i32
    return %arg0, %c0_i32, %c0_i32_0 : i32, i32, i32
  }
  func.func @transform_7(%arg0: i32, %arg1: i32) -> (i32, i32, i32) {
    %c0_i32 = arith.constant 0 : i32
    %c0_i32_0 = arith.constant 0 : i32
    %c0_i32_1 = arith.constant 0 : i32
    return %arg0, %c0_i32, %c0_i32_0 : i32, i32, i32
  }
}

</mosaic_0001>

<bundles_post_ra>
// kernel: spex_plus_loss.1
= control target key start
LH: loop header
LB: loop body
LE: loop exit
PB: predicated region body
PF: predicated region fallthrough
CT: control target
= control target key end

     0   :  { %s2528_s0 = inlined_call_operand.hbm [shape: f32[4,8,128], index: 0, kind: input, shape index: {}]   ;;  %s2529_s1 = inlined_call_operand.hbm [shape: f32[4,8,128], index: 1, kind: input, shape index: {}]   ;;  %s2530_s2 = inlined_call_operand.hbm [shape: f32[4,8,128], index: 2, kind: input, shape index: {}]   ;;  %s2531_s3 = inlined_call_operand.hbm [shape: f32[4,8,128], index: 3, kind: input, shape index: {}]   ;;  %s2532_s4 = inlined_call_operand.vmem [shape: f32[4,1,32], index: 4, kind: input, shape index: {}]   ;;  %s2533_s5 = inlined_call_operand.vmem [shape: s32[4,1,1], index: 5, kind: input, shape index: {}]   ;;  %s2534_s6 = inlined_call_operand.vmem [shape: f32[4,1,128], index: 6, kind: output, shape index: {0}]   ;;  %s2535_s7 = inlined_call_operand.vmem [shape: f32[4,1,128], index: 7, kind: output, shape index: {1}]  }
   0x1   :  { %2540 = sst [smem:[#allocation17_spill]] %s2528_s0 }
   0x2   :  { %2541 = sst [smem:[#allocation18_spill]] %s2529_s1 }
   0x3   :  { %13 = vsyncpa [#allocation4], 0 }
   0x4   :  { %15 = vsyncpa [#allocation4 + $0x1], 0 }
   0x5   :  { %16 = vsyncpa [#allocation6], 0 }
   0x6   :  { %18 = vsyncpa [#allocation6 + $0x1], 0 }
   0x7   :  { %19 = vsyncpa [#allocation9], 0 }
   0x8   :  { %21 = vsyncpa [#allocation9 + $0x1], 0  ;;  %s1895_s24 = smov 0   ;;  %s1897_s25 = smov 0  }
   0x9   :  { %s1899_s26 = smov 0   ;;  %s1901_s27 = smov 0  }
   0xa   :  { %s1903_s28 = smov 0   ;;  %s1905_s29 = smov 0  }
   0xb LB: > { %2542 = sst [smem:[#allocation13_spill]] %s1837_s26  ;;  %s2536_s30 = sadd.s32 4294967295, %s1849_s29   ;;  %s1849_s29 = sphi %s1905_s29, %s27_s29   ;;  %s1845_s28 = sphi %s1903_s28, %s2566_s28   ;;  %s1841_s27 = sphi %s1901_s27, %s2562_s27   ;;  %s1837_s26 = sphi %s1899_s26, %s2561_s26   ;;  %s1833_s25 = sphi %s1897_s25, %s2565_s25   ;;  %s1829_s24 = sphi %s1895_s24, %s2564_s24  }
   0xc   : > { %2543 = sst [smem:[#allocation14_spill]] %s1845_s28  ;;  %s39_s8 = sadd.s32 1, %s1845_s28 }
   0xd   : > { %p41_p0 = scmp.ge.s32.totalorder %s39_s8, 2  ;;  %s48_s9 = sadd.s32 1, %s1837_s26 }
   0xe   : > { %p55_p1 = scmp.ne.s32.totalorder %s1837_s26, %s1833_s25  ;;  %p56_p2 = scmp.eq.s32.totalorder %s1849_s29, 0 }
   0xf   : > { %s2568_s8 = smov (%p41_p0, %s39_s8), 0  ;;  %p61_p4 = scmp.ne.s32.totalorder %s1833_s25, %s1829_s24 }
  0x10   : > { %2544 = sst [smem:[#allocation15_spill]] %s2568_s8  ;;  %p57_p3 = por %p56_p2, %p55_p1 }
  0x11   : > { %s43_s10 = ssub.s32 %s1845_s28, %s2568_s8  ;;  %p62_p5 = scmp.eq.s32.totalorder %s2536_s30, 0 }
  0x12   : > { %p46_p6 = scmp.eq.s32.totalorder %s43_s10, 0  ;;  %p1554_p8 = scmp.lt.s32.totalorder %s1849_s29, 2 }
  0x13   : > { %p1936_p7 = por %p62_p5, %p61_p4  ;;  %s1945_s13 = sand.u32 1, %s1837_s26  }
  0x14   : > { %s1942_s12 = scalar_select %p46_p6, %s1837_s26, %s48_s9  }
  0x15   : > { %s1948_s14 = sshll.u32 %s1845_s28, 4  ;;  %s1951_s15 = sshll.u32 %s1945_s13, 4 }
  0x16   : > { %2546 = sst [smem:[#allocation16_spill]] %s1942_s12  ;;  %p1953_p9 = pnand %p1554_p8, %p57_p3 }
  0x17   : > { %s296_s17 = sand.u32 1, %s1849_s29   ;;  %s2548_s1 = sld [smem:[#allocation18_spill]] }
  0x18   : > { %s300_s21 = scalar_lea.vmem [#allocation5], %s1951_s15  ;;  %p1518_p10 = scmp.ge.s32.totalorder %s1849_s29, 1 }
  0x19   : > { %s309_s22 = sshll.u32 %s300_s21, 4  ;;  %s297_s24 = scalar_lea.sflag [#allocation6], %s296_s17  ;;  %s310_s22 = int_to_ptr.vmem [resolvable:$true] %s309_s22 }
  0x1a   : > { %s1851_s9 = smov 128   ;;  %s1852_s10 = smov 8  }
  0x1b   : > { %p379_p11 = scmp.lt.s32.totalorder %s1849_s29, 3  ;;  %s2550_s0 = sld [smem:[#allocation17_spill]] }
  0x1c   : > { %s277_s30 = scalar_lea.vmem [#allocation3], %s1951_s15  ;;  %s274_s8 = scalar_lea.sflag [#allocation4], %s1945_s13 }
  0x1d   : > { %s306_s20 = scalar_lea.hbm %s2548_s1, %s1948_s14  ;;  %p1970_p12 = pnand %p1518_p10, %p379_p11 }
  0x1e   : > { %s307_s23 = sshll.u32 %s306_s20, 4  ;;  %s286_s17 = sshll.u32 %s277_s30, 4  ;;  %s308_s23 = int_to_ptr.hbm [resolvable:$true] %s307_s23  ;;  %s287_s17 = int_to_ptr.vmem [resolvable:$true] %s286_s17 }
  0x1f   : > { %1547 = dma.hbm_to_vmem [thread:$0]  (!%p1953_p9), %s308_s23, 256, %s310_s22, %s297_s24, %s1851_s9, %s1851_s9, %s1852_s10  }
  0x20   : > { %s329_s19 = scalar_lea.hbm %s2530_s2, %s1948_s14  ;;  %s323_s20 = scalar_lea.vmem [#allocation7], %s1951_s15 }
  0x21   : > { %s283_s21 = scalar_lea.hbm %s2550_s0, %s1948_s14  ;;  %s332_s0 = sshll.u32 %s323_s20, 4  ;;  %s333_s0 = int_to_ptr.vmem [resolvable:$true] %s332_s0 }
  0x22   : > { %s284_s1 = sshll.u32 %s283_s21, 4  ;;  %s330_s28 = sshll.u32 %s329_s19, 4  ;;  %s285_s1 = int_to_ptr.hbm [resolvable:$true] %s284_s1  ;;  %s331_s28 = int_to_ptr.hbm [resolvable:$true] %s330_s28 }
  0x23   : > { %1544 = dma.hbm_to_vmem [thread:$0]  (!%p1953_p9), %s285_s1, 256, %s287_s17, %s274_s8, %s1851_s9, %s1851_s9, %s1852_s10  }
  0x24   : > { %1550 = dma.hbm_to_vmem [thread:$0]  (!%p1953_p9), %s331_s28, 256, %s333_s0, %s297_s24, %s1851_s9, %s1851_s9, %s1852_s10  }
  0x25   : > { %s352_s12 = scalar_lea.hbm %s2531_s3, %s1948_s14  ;;  %s346_s1 = scalar_lea.vmem [#allocation8], %s1951_s15 }
  0x26   : > { %s353_s26 = sshll.u32 %s352_s12, 4  ;;  %s355_s8 = sshll.u32 %s346_s1, 4  ;;  %s354_s26 = int_to_ptr.hbm [resolvable:$true] %s353_s26  ;;  %s356_s8 = int_to_ptr.vmem [resolvable:$true] %s355_s8 }
  0x27   : > { %s343_s17 = scalar_lea.sflag [#allocation9], %s1945_s13  ;;  %383 = sbr.rel (%p1970_p12) target bundleno = 408 (0x198), region = 44 }
  0x28   : > { %1553 = dma.hbm_to_vmem [thread:$0]  (!%p1953_p9), %s354_s26, 256, %s356_s8, %s343_s17, %s1851_s9, %s1851_s9, %s1852_s10  }
  0x29   : > { %s385_s0 = sand.u32 (!%p1970_p12), 1, %s1833_s25  }
  0x2a   : > { %s2009_s28 = sshll.u32 (!%p1970_p12), %s385_s0, 4  ;;  %s386_s12 = scalar_lea.sflag (!%p1970_p12), [#allocation4], %s385_s0 }
  0x2b   : > { %s389_s14 = scalar_lea.vmem (!%p1970_p12), [#allocation3], %s2009_s28 }
  0x2c   : > { %1816 = dma.done.wait (%p1936_p7), %s386_s12, 256  }
  0x2d   : > { %1818 = vsyncadd (%p1936_p7), %s386_s12, 4294967040  ;;  %s2551_s13 = sadd.s32 4294967295, %s1849_s29   ;;  %s399_s16 = scalar_lea.vmem [#allocation5], %s2009_s28 }
  0x2e   : > { %s395_s26 = sand.u32 1, %s2551_s13  }
  0x2f   : > { %s396_s15 = scalar_lea.sflag [#allocation6], %s395_s26 }
  0x30   : > { %1820 = dma.done.wait (%p1936_p7), %s396_s15, 512  }
  0x31   : > { %1822 = vsyncadd (%p1936_p7), %s396_s15, 4294966784  ;;  %s409_s24 = scalar_lea.vmem [#allocation7], %s2009_s28  ;;  %s416_s9 = scalar_lea.sflag [#allocation9], %s385_s0 }
  0x32   : > { %s419_s10 = scalar_lea.vmem [#allocation8], %s2009_s28 }
  0x33   : > { %1824 = dma.done.wait (%p1936_p7), %s416_s9, 256  }
  0x34   : > { %1826 = vsyncadd (%p1936_p7), %s416_s9, 4294967040  ;;  %v503_v0 = vld [vmem:[%s389_s14] sm:$0xff]  ;;  %v502_v3 = vld [vmem:[%s419_s10 + $0x8] sm:$0xff]  ;;  %v1853_v12 = vmov 0   ;;  %s1523_s11 = sshll.u32 %s1841_s27, 1  ;;  %vm1277_vm0 = vcmask 253952  }
  0x35   : > { %v501_v1 = vld [vmem:[%s419_s10] sm:$0xff]  ;;  %680 = vadd.xlane.f32.xlu2 %v503_v0  ;;  %v547_v5 = vmul.f32 %v502_v3, %v502_v3  ;;  %v504_v7 = vld [vmem:[%s389_s14 + $0x8] sm:$0xff]  ;;  %1607 = vset.pattern.permute.xlu0 %v1853_v12  ;;  %v566_v18 = vmul.f32 %v503_v0, %v503_v0  ;;  %p482_p13 = scmp.lt.s32.totalorder %s1523_s11, 3  ;;  %v1854_v29 = vmov 1024.0  }
  0x36   : > { %672 = vadd.xlane.f32.xlu0 %v501_v1  ;;  %v546_v2 = vmul.f32 %v501_v1, %v501_v1  ;;  %v505_v4 = vld [vmem:[%s399_s16] sm:$0xff]  ;;  %v506_v8 = vld [vmem:[%s399_s16 + $0x8] sm:$0xff]  ;;  %v577_v11 = vmul.f32 %v503_v0, %v501_v1  ;;  %1608 = vset.pattern.permute.xlu1 %v1853_v12  ;;  %v578_v13 = vmul.f32 %v504_v7, %v502_v3  ;;  %1609 = vrcp.f32 %v1854_v29 }
  0x37   : > { %v507_v6 = vld [vmem:[%s409_s24] sm:$0xff]  ;;  %v608_v9 = vmul.f32 %v505_v4, %v501_v1  ;;  %v508_v10 = vld [vmem:[%s409_s24 + $0x8] sm:$0xff]  ;;  %v609_v15 = vmul.f32 %v506_v8, %v502_v3  ;;  %v597_v17 = vmul.f32 %v505_v4, %v505_v4  ;;  %v567_v19 = vmul.f32 %v504_v7, %v504_v7  ;;  %s2570_s11 = smov (!%p482_p13, %s1523_s11), 3 }
  0x38   : > { %676 = vadd.xlane.f32.xlu1 %v546_v2  ;;  %v639_v14 = vmul.f32 %v507_v6, %v501_v1  ;;  %v640_v16 = vmul.f32 %v508_v10, %v502_v3  ;;  %v628_v20 = vmul.f32 %v507_v6, %v507_v6  ;;  %v598_v21 = vmul.f32 %v506_v8, %v506_v8  ;;  %s484_s23 = scalar_lea.vmem %s2532_s4, %s2570_s11  ;;  %s489_s20 = scalar_lea.vmem %s2533_s5, %s2570_s11 }
  0x39   : > { %v2036_v22 = vld [vmem:[%s484_s23 + $0x1] sm:$0x1]  ;;  %v629_v23 = vmul.f32 %v508_v10, %v508_v10  ;;  %v2038_v24 = vld [vmem:[%s484_s23] sm:$0x1]  ;;  %s494_s1 = scalar_lea.vmem %s2534_s6, %s2570_s11  ;;  %s499_s0 = scalar_lea.vmem %s2535_s7, %s2570_s11 }
  0x3a   : > { %v1287_v25 = vsel %vm1277_vm0, %v2036_v22, -inf  ;;  %v1284_v26 = vsel %vm1277_vm0, %v2038_v24, -inf  ;;  %v1261_v27 = vld [vmem:[%s489_s20] sm:$0x1]  ;;  %v1262_v28 = vld [vmem:[%s489_s20 + $0x1] sm:$0x1] }
  0x3c   : > { %v1610_v30 = vpop.eup %1609 }
  0x3d   : > { %692 = vadd.xlane.f32.xlu2 %v505_v4  ;;  %v851_v31 = vmul.f32 1024.0, %v1610_v30  ;;  %vm855_vm1 = vweird.f32 %v1610_v30 }
  0x3e   : > { %674 = vadd.xlane.f32.xlu0 %v502_v3 }
  0x3f   : > { %v852_v34 = vsub.f32 1.0, %v851_v31 }
  0x40   : > { %678 = vadd.xlane.f32.xlu1 %v547_v5 }
  0x41   : > { %v853_v39 = vmul.f32 %v1610_v30, %v852_v34 }
  0x43   : > { %v854_v45 = vadd.f32 %v1610_v30, %v853_v39 }
  0x45   : > { %704 = vadd.xlane.f32.xlu2 %v507_v6  ;;  %v2050_v57 = vsel %vm855_vm1, %v1610_v30, %v854_v45 }
  0x46   : > { %682 = vadd.xlane.f32.xlu0 %v504_v7 }
  0x48   : > { %694 = vadd.xlane.f32.xlu1 %v506_v8 }
  0x4d   : > { %700 = vadd.xlane.f32.xlu2 %v608_v9 }
  0x4e   : > { %706 = vadd.xlane.f32.xlu0 %v508_v10 }
  0x50   : > { %688 = vadd.xlane.f32.xlu1 %v577_v11 }
  0x55   : > { %712 = vadd.xlane.f32.xlu2 %v639_v14 }
  0x56   : > { %690 = vadd.xlane.f32.xlu0 %v578_v13 }
  0x58   : > { %702 = vadd.xlane.f32.xlu1 %v609_v15 }
  0x5d   : > { %696 = vadd.xlane.f32.xlu2 %v597_v17 }
  0x5e   : > { %714 = vadd.xlane.f32.xlu0 %v640_v16 }
  0x60   : > { %684 = vadd.xlane.f32.xlu1 %v566_v18 }
  0x65   : > { %708 = vadd.xlane.f32.xlu2 %v628_v20 }
  0x66   : > { %686 = vadd.xlane.f32.xlu0 %v567_v19 }
  0x68   : > { %698 = vadd.xlane.f32.xlu1 %v598_v21 }
  0x6d   : > { %1288 = vmax.xlane.f32.xlu2 %v1287_v25 }
  0x6e   : > { %710 = vadd.xlane.f32.xlu0 %v629_v23 }
  0x70   : > { %1285 = vmax.xlane.f32.xlu1 %v1284_v26 }
  0x82   : > { %1266 = vperm.xlu0 %1607, %v1261_v27  }
  0x89   : > { %1270 = vperm.xlu1 %1608, %v1262_v28  }
  0xa8   : > { %v681_v32 = vpop.xlane.xlu2 %680 }
  0xa9   : > { %v673_v33 = vpop.xlane.xlu0 %672  ;;  %v740_v42 = vrot.slane %v681_v32, 4 }
  0xaa   : > { %v716_v35 = vrot.slane %v673_v33, 4 }
  0xab   : > { %v677_v36 = vpop.xlane.xlu1 %676  ;;  %v741_v51 = vadd.f32 %v740_v42, %v681_v32 }
  0xac   : > { %v717_v37 = vadd.f32 %v716_v35, %v673_v33  ;;  %v728_v38 = vrot.slane %v677_v36, 4 }
  0xad   : > { %v742_v61 = vrot.slane %v741_v51, 2 }
  0xae   : > { %v718_v40 = vrot.slane %v717_v37, 2  ;;  %v729_v41 = vadd.f32 %v728_v38, %v677_v36 }
  0xaf   : > { %v743_v10 = vadd.f32 %v742_v61, %v741_v51 }
  0xb0   : > { %v719_v43 = vadd.f32 %v718_v40, %v717_v37  ;;  %v730_v44 = vrot.slane %v729_v41, 2  ;;  %v693_v46 = vpop.xlane.xlu2 %692 }
  0xb1   : > { %v675_v47 = vpop.xlane.xlu0 %674  ;;  %v776_v50 = vrot.slane %v693_v46, 4  ;;  %v744_v20 = vrot.slane %v743_v10, 1 }
  0xb2   : > { %v720_v48 = vrot.slane %v719_v43, 1  ;;  %v731_v49 = vadd.f32 %v730_v44, %v729_v41  ;;  %v722_v52 = vrot.slane %v675_v47, 4 }
  0xb3   : > { %v679_v53 = vpop.xlane.xlu1 %678  ;;  %v777_v56 = vadd.f32 %v776_v50, %v693_v46  ;;  %v2063_v34 = vadd.f32 %v744_v20, %v743_v10 }
  0xb4   : > { %v2048_v54 = vadd.f32 %v720_v48, %v719_v43  ;;  %v732_v55 = vrot.slane %v731_v49, 1  ;;  %v723_v58 = vadd.f32 %v722_v52, %v675_v47  ;;  %v734_v59 = vrot.slane %v679_v53, 4 }
  0xb5   : > { %v778_v62 = vrot.slane %v777_v56, 2 }
  0xb6   : > { %v848_v60 = vmul.f32 %v2048_v54, %v2048_v54  ;;  %v724_v63 = vrot.slane %v723_v58, 2  ;;  %v735_v0 = vadd.f32 %v734_v59, %v679_v53  ;;  %v733_v2 = vadd.f32 %v732_v55, %v731_v49 }
  0xb7   : > { %v779_v11 = vadd.f32 %v778_v62, %v777_v56  ;;  %v861_v49 = vmul.f32 %v2063_v34, %v2048_v54 }
  0xb8   : > { %v857_v1 = vmul.f32 %v2050_v57, %v848_v60  ;;  %v725_v3 = vadd.f32 %v724_v63, %v723_v58  ;;  %v736_v4 = vrot.slane %v735_v0, 2  ;;  %v705_v5 = vpop.xlane.xlu2 %704 }
  0xb9   : > { %v683_v6 = vpop.xlane.xlu0 %682  ;;  %v812_v8 = vrot.slane %v705_v5, 4  ;;  %v780_v21 = vrot.slane %v779_v11, 1  ;;  %v863_v10 = vmul.f32 %v861_v49, %v2050_v57 }
  0xba   : > { %v2055_v7 = vsub.f32 %v733_v2, %v857_v1  ;;  %v746_v9 = vrot.slane %v683_v6, 4  ;;  %v726_v12 = vrot.slane %v725_v3, 1  ;;  %v737_v13 = vadd.f32 %v736_v4, %v735_v0 }
  0xbb   : > { %v695_v14 = vpop.xlane.xlu1 %694  ;;  %v813_v19 = vadd.f32 %v812_v8, %v705_v5  ;;  %v2065_v35 = vadd.f32 %v780_v21, %v779_v11 }
  0xbc   : > { %v873_v15 = vadd.f32 1e-06, %v2055_v7  ;;  %v747_v16 = vadd.f32 %v746_v9, %v683_v6  ;;  %v2058_v17 = vadd.f32 %v726_v12, %v725_v3  ;;  %v738_v18 = vrot.slane %v737_v13, 1 }
  0xbd   : > { %v782_v26 = vrot.slane %v695_v14, 4  ;;  %v814_v29 = vrot.slane %v813_v19, 2  ;;  %v1009_v47 = vmul.f32 %v2065_v35, %v2048_v54 }
  0xbe   : > { %1611 = vrcp.f32 %v873_v15  ;;  %v849_v23 = vmul.f32 %v2058_v17, %v2058_v17  ;;  %v748_v25 = vrot.slane %v747_v16, 2  ;;  %v739_v28 = vadd.f32 %v738_v18, %v737_v13 }
  0xbf   : > { %v783_v40 = vadd.f32 %v782_v26, %v695_v14  ;;  %v815_v43 = vadd.f32 %v814_v29, %v813_v19  ;;  %v884_v53 = vand.u32 2147483647, %v873_v15  ;;  %v886_v58 = vand.u32 2147483648, %v873_v15 }
  0xc0   : > { %v858_v27 = vmul.f32 %v2050_v57, %v849_v23  ;;  %v749_v30 = vadd.f32 %v748_v25, %v747_v16  ;;  %v701_v32 = vpop.xlane.xlu2 %700  ;;  %v1011_v1 = vmul.f32 %v1009_v47, %v2050_v57  ;;  %vm880_vm3 = vweird.f32 %v873_v15 }
  0xc1   : > { %v707_v31 = vpop.xlane.xlu0 %706  ;;  %v800_v33 = vrot.slane %v701_v32, 4  ;;  %v816_v55 = vrot.slane %v815_v43, 1  ;;  %v784_v56 = vrot.slane %v783_v40, 2  ;;  %vm885_vm5 = vcmp.eq.f32.partialorder %v884_v53, 8.507059e+37 }
  0xc2   : > { %v2067_v36 = vsub.f32 %v739_v28, %v858_v27  ;;  %v750_v39 = vrot.slane %v749_v30, 1  ;;  %v818_v48 = vrot.slane %v707_v31, 4  ;;  %v887_v9 = vor.u32 1.1754944e-38, %v886_v58 }
  0xc3   : > { %v689_v37 = vpop.xlane.xlu1 %688  ;;  %v801_v41 = vadd.f32 %v800_v33, %v701_v32  ;;  %v2083_v13 = vadd.f32 %v816_v55, %v815_v43  ;;  %v785_v14 = vadd.f32 %v784_v56, %v783_v40 }
  0xc4   : > { %v1612_v38 = vpop.eup %1611  ;;  %v2070_v42 = vadd.f32 1e-06, %v2067_v36  ;;  %v764_v45 = vrot.slane %v689_v37, 4  ;;  %v2077_v50 = vadd.f32 %v750_v39, %v749_v30  ;;  %v819_v0 = vadd.f32 %v818_v48, %v707_v31 }
  0xc5   : > { %v876_v44 = vmul.f32 %v1612_v38, %v873_v15  ;;  %v802_v46 = vrot.slane %v801_v41, 2  ;;  %vm881_vm2 = vweird.f32 %v1612_v38  ;;  %v786_v53 = vrot.slane %v785_v14, 1 }
  0xc6   : > { %1613 = vrcp.f32 %v2070_v42  ;;  %v765_v59 = vadd.f32 %v764_v45, %v689_v37  ;;  %v862_v3 = vmul.f32 %v2077_v50, %v2058_v17  ;;  %vm882_vm4 = vmor %vm880_vm3, %vm881_vm2  ;;  %v820_v25 = vrot.slane %v819_v0, 2 }
  0xc7   : > { %v803_v51 = vadd.f32 %v802_v46, %v801_v41  ;;  %v877_v52 = vsub.f32 1.0, %v876_v44  ;;  %v899_v46 = vand.u32 2147483647, %v2070_v42  ;;  %vm895_vm7 = vweird.f32 %v2070_v42 }
  0xc8   : > { %v766_v2 = vrot.slane %v765_v59, 2  ;;  %v713_v12 = vpop.xlane.xlu2 %712  ;;  %v864_v27 = vmul.f32 %v862_v3, %v2050_v57 }
  0xc9   : > { %v691_v60 = vpop.xlane.xlu0 %690  ;;  %v804_v61 = vrot.slane %v803_v51, 1  ;;  %v878_v62 = vmul.f32 %v1612_v38, %v877_v52  ;;  %v836_v28 = vrot.slane %v713_v12, 4  ;;  %vm900_vm9 = vcmp.eq.f32.partialorder %v899_v46, 8.507059e+37 }
  0xca   : > { %v770_v63 = vrot.slane %v691_v60, 4  ;;  %v767_v11 = vadd.f32 %v766_v2, %v765_v59  ;;  %v821_v2 = vadd.f32 %v820_v25, %v819_v0 }
  0xcb   : > { %v805_v4 = vadd.f32 %v804_v61, %v803_v51  ;;  %v879_v5 = vadd.f32 %v1612_v38, %v878_v62  ;;  %v703_v18 = vpop.xlane.xlu1 %702  ;;  %v837_v39 = vadd.f32 %v836_v28, %v713_v12 }
  0xcc   : > { %v771_v6 = vadd.f32 %v770_v63, %v691_v60  ;;  %v1614_v8 = vpop.eup %1613  ;;  %v768_v20 = vrot.slane %v767_v11, 1  ;;  %v806_v32 = vrot.slane %v703_v18, 4  ;;  %v1127_v63 = vmul.f32 %v2083_v13, %v2048_v54 }
  0xcd   : > { %v883_v16 = vsel %vm882_vm4, %v1612_v38, %v879_v5  ;;  %v2085_v15 = vsub.f32 %v805_v4, %v1011_v1  ;;  %v891_v23 = vmul.f32 %v1614_v8, %v2070_v42  ;;  %vm896_vm6 = vweird.f32 %v1614_v8 }
  0xce   : > { %v2087_v19 = vsel %vm885_vm5, %v887_v9, %v883_v16  ;;  %v772_v21 = vrot.slane %v771_v6, 2  ;;  %v769_v29 = vadd.f32 %v768_v20, %v767_v11  ;;  %v901_v38 = vand.u32 2147483648, %v2070_v42  ;;  %vm897_vm8 = vmor %vm895_vm7, %vm896_vm6 }
  0xcf   : > { %v2092_v26 = vmul.f32 %v2085_v15, %v2087_v19  ;;  %v892_v31 = vsub.f32 1.0, %v891_v23  ;;  %v807_v44 = vadd.f32 %v806_v32, %v703_v18  ;;  %v838_v47 = vrot.slane %v837_v39, 2 }
  0xd0   : > { %v773_v30 = vadd.f32 %v772_v21, %v771_v6  ;;  %v2098_v40 = vsub.f32 %v769_v29, %v863_v10  ;;  %v902_v55 = vor.u32 1.1754944e-38, %v901_v38  ;;  %v697_v42 = vpop.xlane.xlu2 %696  ;;  %v2123_v10 = vadd.f32 %v786_v53, %v785_v14 }
  0xd1   : > { %v715_v33 = vpop.xlane.xlu0 %714  ;;  %v1023_v37 = vmul.f32 %v2092_v26, %v2092_v26  ;;  %v893_v43 = vmul.f32 %v1614_v8, %v892_v31  ;;  %v839_v56 = vadd.f32 %v838_v47, %v837_v39  ;;  %v808_v58 = vrot.slane %v807_v44, 2 }
  0xd2   : > { %v774_v41 = vrot.slane %v773_v30, 1  ;;  %v842_v48 = vrot.slane %v715_v33, 4  ;;  %v2104_v49 = vmul.f32 %v2087_v19, %v2098_v40  ;;  %v788_v54 = vrot.slane %v697_v42, 4 }
  0xd3   : > { %v1025_v45 = vmul.f32 %v1023_v37, %v2055_v7  ;;  %v894_v52 = vadd.f32 %v1614_v8, %v893_v43  ;;  %v840_v5 = vrot.slane %v839_v56, 1  ;;  %v809_v9 = vadd.f32 %v808_v58, %v807_v44  ;;  %v685_v11 = vpop.xlane.xlu1 %684 }
  0xd4   : > { %v775_v51 = vadd.f32 %v774_v41, %v773_v30  ;;  %v905_v60 = vmul.f32 %v2104_v49, %v2104_v49  ;;  %v843_v1 = vadd.f32 %v842_v48, %v715_v33  ;;  %v822_v16 = vrot.slane %v821_v2, 1 }
  0xd5   : > { %v2108_v59 = vmax.f32 %v1025_v45, 0.0  ;;  %v898_v62 = vsel %vm897_vm8, %v1614_v8, %v894_v52  ;;  %v841_v8 = vadd.f32 %v840_v5, %v839_v56  ;;  %v1129_v18 = vmul.f32 %v1127_v63, %v2050_v57 }
  0xd6   : > { %v2112_v61 = vsub.f32 %v775_v51, %v864_v27  ;;  %v907_v3 = vmul.f32 %v905_v60, %v2055_v7  ;;  %v2117_v4 = vsel %vm900_vm9, %v902_v55, %v898_v62  ;;  %v844_v12 = vrot.slane %v843_v1, 2 }
  0xd7   : > { %1615 = vrsqrt.f32 %v2108_v59  ;;  %v810_v20 = vrot.slane %v809_v9, 1  ;;  %v752_v23 = vrot.slane %v685_v11, 4  ;;  %v1010_v14 = vmul.f32 %v2123_v10, %v2058_v17 }
  0xd8   : > { %v2121_v6 = vmul.f32 %v2117_v4, %v2112_v61  ;;  %v2126_v0 = vmax.f32 %v907_v3, 0.0  ;;  %v2133_v25 = vsub.f32 %v841_v8, %v1129_v18  ;;  %v789_v27 = vadd.f32 %v788_v54, %v697_v42 }
  0xd9   : > { %v845_v28 = vadd.f32 %v844_v12, %v843_v1  ;;  %v2137_v30 = vadd.f32 %v822_v16, %v821_v2  ;;  %v811_v31 = vadd.f32 %v810_v20, %v809_v9  ;;  %v753_v37 = vadd.f32 %v752_v23, %v685_v11 }
  0xda   : > { %v906_v21 = vmul.f32 %v2121_v6, %v2121_v6  ;;  %1617 = vrsqrt.f32 %v2126_v0  ;;  %v790_v33 = vrot.slane %v789_v27, 2  ;;  %v2143_v38 = vmul.f32 %v2133_v25, %v2087_v19 }
  0xdb   : > { %v1012_v39 = vmul.f32 %v1010_v14, %v2050_v57  ;;  %v846_v43 = vrot.slane %v845_v28, 1  ;;  %v1128_v44 = vmul.f32 %v2137_v30, %v2058_v17  ;;  %v754_v48 = vrot.slane %v753_v37, 2 }
  0xdc   : > { %v908_v32 = vmul.f32 %v906_v21, %v2067_v36  ;;  %v791_v47 = vadd.f32 %v790_v33, %v789_v27  ;;  %v1141_v19 = vmul.f32 %v2143_v38, %v2143_v38  ;;  %v1015_v55 = vmul.f32 %v2065_v35, %v2065_v35 }
  0xdd   : > { %v2135_v29 = vpop.eup %1615  ;;  %v2150_v45 = vsub.f32 %v811_v31, %v1012_v39  ;;  %v847_v53 = vadd.f32 %v846_v43, %v845_v28  ;;  %v1029_v56 = vmul.f32 2.0, %v2092_v26  ;;  %v1130_v58 = vmul.f32 %v1128_v44, %v2050_v57  ;;  %v687_v26 = vpop.xlane.xlu0 %686 }
  0xde   : > { %v1040_v41 = vmul.f32 %v2135_v29, %v2108_v59  ;;  %v2152_v46 = vmax.f32 %v908_v32, 0.0  ;;  %v792_v62 = vrot.slane %v791_v47, 1  ;;  %v755_v63 = vadd.f32 %v754_v48, %v753_v37  ;;  %v709_v39 = vpop.xlane.xlu2 %708 }
  0xdf   : > { %v1022_v17 = vmul.f32 %v2150_v45, %v2117_v4  ;;  %v867_v1 = vmul.f32 %v2063_v34, %v2063_v34  ;;  %v911_v42 = vmul.f32 2.0, %v2104_v49  ;;  %v1143_v35 = vmul.f32 %v1141_v19, %v2055_v7 }
  0xe0   : > { %v2154_v51 = vpop.eup %1617  ;;  %v1041_v52 = vmul.f32 %v2135_v29, %v1040_v41  ;;  %1619 = vrsqrt.f32 %v2152_v46  ;;  %v2172_v3 = vsub.f32 %v847_v53, %v1130_v58  ;;  %v1031_v5 = vmul.f32 %v1029_v56, %v2085_v15 }
  0xe1   : > { %v922_v60 = vmul.f32 %v2154_v51, %v2126_v0  ;;  %v1024_v9 = vmul.f32 %v1022_v17, %v1022_v17  ;;  %v1017_v8 = vmul.f32 %v1015_v55, %v2050_v57  ;;  %v793_v11 = vadd.f32 %v792_v62, %v791_v47 }
  0xe2   : > { %v1042_v2 = vmul.f32 0.5, %v1041_v52  ;;  %v756_v12 = vrot.slane %v755_v63, 1  ;;  %v758_v16 = vrot.slane %v687_v26, 4  ;;  %v2179_v34 = vmul.f32 %v2083_v13, %v2083_v13 }
  0xe3   : > { %v923_v54 = vmul.f32 %v2154_v51, %v922_v60  ;;  %v913_v7 = vmul.f32 %v911_v42, %v2098_v40  ;;  %v2182_v49 = vmax.f32 %v1143_v35, 0.0  ;;  %v869_v18 = vmul.f32 %v867_v1, %v2050_v57 }
  0xe4   : > { %v1043_v15 = vsub.f32 1.5, %v1042_v2  ;;  %v1140_v21 = vmul.f32 %v2172_v3, %v2117_v4  ;;  %v1019_v23 = vsub.f32 %v793_v11, %v1017_v8  ;;  %v1033_v14 = vsub.f32 %v2108_v59, %v1031_v5 }
  0xe5   : > { %v868_v27 = vmul.f32 %v2077_v50, %v2077_v50  ;;  %v1026_v13 = vmul.f32 %v1024_v9, %v2067_v36  ;;  %v757_v28 = vadd.f32 %v756_v12, %v755_v63  ;;  %v759_v40 = vadd.f32 %v758_v16, %v687_v26 }
  0xe6   : > { %v2185_v20 = vpop.eup %1619  ;;  %v2195_v31 = vmul.f32 %v2123_v10, %v2123_v10  ;;  %v924_v32 = vmul.f32 0.5, %v923_v54  ;;  %v1035_v33 = vadd.f32 %v1033_v14, %v1019_v23  ;;  %v915_v37 = vsub.f32 %v2126_v0, %v913_v7 }
  0xe7   : > { %v934_v4 = vmul.f32 %v2185_v20, %v2152_v46  ;;  %1621 = vrsqrt.f32 %v2182_v49  ;;  %v871_v41 = vsub.f32 %v757_v28, %v869_v18  ;;  %v760_v50 = vrot.slane %v759_v40, 2  ;;  %v711_v18 = vpop.xlane.xlu0 %710 }
  0xe8   : > { %v1044_v43 = vmul.f32 %v2135_v29, %v1043_v15  ;;  %v912_v44 = vmul.f32 2.0, %v2121_v6  ;;  %v1142_v47 = vmul.f32 %v1140_v21, %v1140_v21  ;;  %v2203_v48 = vmax.f32 %v1035_v33, 0.0 }
  0xe9   : > { %v2205_v10 = vmax.f32 %v1026_v13, 0.0  ;;  %v917_v19 = vadd.f32 %v915_v37, %v871_v41  ;;  %v761_v52 = vadd.f32 %v760_v50, %v759_v40  ;;  %v824_v53 = vrot.slane %v709_v39, 4 }
  0xea   : > { %v2209_v55 = vmul.f32 %v2137_v30, %v2137_v30  ;;  %vm1046_vm10 = vcmp.eq.f32.partialorder %v2108_v59, inf  ;;  %v925_v56 = vsub.f32 1.5, %v924_v32  ;;  %1623 = vrsqrt.f32 %v2203_v48 }
  0xeb   : > { %v1049_v29 = vand.u32 2147483648, %v2108_v59  ;;  %v935_v6 = vmul.f32 %v2185_v20, %v934_v4  ;;  %v1147_v58 = vmul.f32 2.0, %v2143_v38  ;;  %v1030_v60 = vmul.f32 2.0, %v1022_v17  ;;  %v699_v38 = vpop.xlane.xlu1 %698 }
  0xec   : > { %v931_v62 = vand.u32 2147483648, %v2126_v0  ;;  %v1144_v63 = vmul.f32 %v1142_v47, %v2067_v36  ;;  %v2218_v1 = vmax.f32 %v917_v19, 0.0  ;;  %v762_v30 = vrot.slane %v761_v52, 1 }
  0xed   : > { %v2220_v42 = vpop.eup %1621  ;;  %v1045_v35 = vmul.f32 %v1044_v43, %v2108_v59  ;;  %vm928_vm11 = vcmp.eq.f32.partialorder %v2126_v0, inf  ;;  %v914_v26 = vmul.f32 %v912_v44, %v2112_v61  ;;  %1625 = vrsqrt.f32 %v2205_v10 }
  0xee   : > { %v825_v2 = vadd.f32 %v824_v53, %v709_v39  ;;  %v926_v17 = vmul.f32 %v2154_v51, %v925_v56  ;;  %v1148_v5 = vmul.f32 2.0, %v1140_v21  ;;  %1627 = vrsqrt.f32 %v2218_v1 }
  0xef   : > { %v870_v36 = vmul.f32 %v868_v27, %v2050_v57  ;;  %v2229_v9 = vmul.f32 0.5, %v935_v6  ;;  %v1149_v8 = vmul.f32 %v1147_v58, %v2133_v25  ;;  %v2233_v54 = vmul.f32 %v1030_v60, %v2150_v45 }
  0xf0   : > { %v763_v11 = vadd.f32 %v762_v30, %v761_v52  ;;  %v1624_v61 = vpop.eup %1623  ;;  %v1158_v12 = vmul.f32 %v2220_v42, %v2182_v49  ;;  %v2237_v16 = vmax.f32 %v1144_v63, 0.0  ;;  %v826_v51 = vrot.slane %v825_v2, 2  ;;  %v2270_v30 = vpop.xlane.xlu2 %1288 }
  0xf1   : > { %v794_v7 = vrot.slane %v699_v38, 4  ;;  %v2242_v15 = vsel %vm1046_vm10, %v2108_v59, %v1045_v35  ;;  %v1064_v25 = vmul.f32 %v1624_v61, %v2203_v48  ;;  %v916_v45 = vsub.f32 %v2152_v46, %v914_v26 }
  0xf2   : > { %v872_v21 = vsub.f32 %v763_v11, %v870_v36  ;;  %v927_v23 = vmul.f32 %v926_v17, %v2126_v0  ;;  %v2248_v14 = vmul.f32 %v1148_v5, %v2172_v3  ;;  %v827_v27 = vadd.f32 %v826_v51, %v825_v2 }
  0xf3   : > { %v795_v13 = vadd.f32 %v794_v7, %v699_v38  ;;  %v2250_v28 = vpop.eup %1625  ;;  %v937_v40 = vsub.f32 1.5, %v2229_v9  ;;  %v1065_v32 = vmul.f32 %v1624_v61, %v1064_v25  ;;  %v830_v37 = vrot.slane %v711_v18, 4  ;;  %v2268_v63 = vpop.xlane.xlu1 %1285 }
  0xf4   : > { %v918_v33 = vadd.f32 %v916_v45, %v872_v21  ;;  %v1628_v39 = vpop.eup %1627  ;;  %v1159_v4 = vmul.f32 %v2220_v42, %v1158_v12  ;;  %1629 = vrsqrt.f32 %v2237_v16  ;;  %v828_v41 = vrot.slane %v827_v27, 1 }
  0xf5   : > { %v796_v50 = vrot.slane %v795_v13, 2  ;;  %v1066_v43 = vmul.f32 0.5, %v1065_v32  ;;  %v946_v3 = vmul.f32 %v1628_v39, %v2218_v1  ;;  %v831_v47 = vadd.f32 %v830_v37, %v711_v18 }
  0xf6   : > { %v2256_v44 = vmax.f32 %v918_v33, 0.0  ;;  %v2261_v19 = vsel %vm928_vm11, %v2126_v0, %v927_v23  ;;  %v1135_v52 = vmul.f32 %v2179_v34, %v2050_v57  ;;  %v829_v53 = vadd.f32 %v828_v41, %v827_v27 }
  0xf7   : > { %v797_v56 = vadd.f32 %v796_v50, %v795_v13  ;;  %v1052_v6 = vmul.f32 %v2250_v28, %v2205_v10  ;;  %v1067_v58 = vsub.f32 1.5, %v1066_v43  ;;  %v947_v60 = vmul.f32 %v1628_v39, %v946_v3 }
  0xf8   : > { %1631 = vrsqrt.f32 %v2256_v44  ;;  %v2272_v35 = vmul.f32 0.5, %v1159_v4  ;;  %vm1070_vm12 = vcmp.eq.f32.partialorder %v2203_v48, inf  ;;  %v1137_v26 = vsub.f32 %v829_v53, %v1135_v52 }
  0xf9   : > { %v1151_v34 = vsub.f32 %v2182_v49, %v1149_v8  ;;  %v1068_v2 = vmul.f32 %v1624_v61, %v1067_v58  ;;  %v948_v38 = vmul.f32 0.5, %v947_v60  ;;  %v798_v17 = vrot.slane %v797_v56, 1 }
  0xfa   : > { %v832_v5 = vrot.slane %v831_v47, 2  ;;  %v2276_v36 = vpop.eup %1629  ;;  %v1018_v12 = vmul.f32 %v2195_v31, %v2050_v57  ;;  %v1290_v51 = vsub.f32 %v2038_v24, %v2268_v63  ;;  %v1291_v7 = vsub.f32 %v2036_v22, %v2270_v30 }
  0xfb   : > { %v1153_v11 = vadd.f32 %v1151_v34, %v1137_v26  ;;  %v1069_v18 = vmul.f32 %v1068_v2, %v2203_v48  ;;  %v949_v25 = vsub.f32 1.5, %v948_v38  ;;  %v799_v8 = vadd.f32 %v798_v17, %v797_v56 }
  0xfc   : > { %v833_v61 = vadd.f32 %v832_v5, %v831_v47  ;;  %vm1048_vm13 = vcmp.eq.f32.partialorder %v2108_v59, 0.0  ;;  %vm930_vm14 = vcmp.eq.f32.partialorder %v2126_v0, 0.0  ;;  %vm1072_vm15 = vcmp.eq.f32.partialorder %v2203_v48, 0.0 }
  0xfd   : > { %v1073_v21 = vand.u32 2147483648, %v2203_v48  ;;  %v2289_v31 = vmax.f32 %v1153_v11, 0.0  ;;  %v1292_v45 = vmul.f32 1.442695, %v1290_v51  ;;  %v1071_v27 = vsel %vm1070_vm12, %v2203_v48, %v1069_v18 }
  0xfe   : > { %v1632_v23 = vpop.eup %1631  ;;  %v950_v13 = vmul.f32 %v1628_v39, %v949_v25  ;;  %v1020_v32 = vsub.f32 %v799_v8, %v1018_v12  ;;  %v834_v33 = vrot.slane %v833_v61, 1  ;;  %v1034_v41 = vsub.f32 %v2205_v10, %v2233_v54  ;;  %v1267_v8 = vpop.permute.xlu0 %1266 }
  0xff   : > { %v1074_v37 = vsel %vm1072_vm15, %v1073_v21, %v1071_v27  ;;  %v958_v4 = vmul.f32 %v1632_v23, %v2256_v44  ;;  %1633 = vrsqrt.f32 %v2289_v31  ;;  %v1136_v3 = vmul.f32 %v2209_v55, %v2050_v57 }
 0x100   : > { %v2298_v50 = vadd.f32 1e-06, %v1074_v37  ;;  %v951_v43 = vmul.f32 %v950_v13, %v2218_v1  ;;  %v1294_v47 = vmul.f32 1.442695, %v1291_v7  ;;  %v1036_v39 = vadd.f32 %v1034_v41, %v1020_v32 }
 0x101   : > { %v959_v48 = vmul.f32 %v1632_v23, %v958_v4  ;;  %v835_v52 = vadd.f32 %v834_v33, %v833_v61  ;;  %1635 = vpow2.f32 %v1292_v45  ;;  %vm952_vm1 = vcmp.eq.f32.partialorder %v2218_v1, inf }
 0x102   : > { %1637 = vrcp.f32 %v2298_v50  ;;  %vm954_vm2 = vcmp.eq.f32.partialorder %v2218_v1, 0.0  ;;  %v955_v54 = vand.u32 2147483648, %v2218_v1  ;;  %v953_v53 = vsel %vm952_vm1, %v2218_v1, %v951_v43 }
 0x103   : > { %v960_v56 = vmul.f32 0.5, %v959_v48  ;;  %v2308_v58 = vmax.f32 %v1036_v39, 0.0  ;;  %v1138_v60 = vsub.f32 %v835_v52, %v1136_v3  ;;  %v943_v57 = vand.u32 2147483648, %v2152_v46 }
 0x104   : > { %v956_v55 = vsel %vm954_vm2, %v955_v54, %v953_v53  ;;  %v1152_v26 = vsub.f32 %v2237_v16, %v2248_v14  ;;  %1639 = vpow2.f32 %v1294_v47  ;;  %v1053_v2 = vmul.f32 %v2250_v28, %v1052_v6 }
 0x105   : > { %v1634_v34 = vpop.eup %1633  ;;  %v2314_v38 = vadd.f32 1e-06, %v956_v55  ;;  %v961_v17 = vsub.f32 1.5, %v960_v56  ;;  %1641 = vrsqrt.f32 %v2308_v58  ;;  %v2322_v1 = vsel %vm1048_vm13, %v1049_v29, %v2242_v15  ;;  %v1271_v55 = vpop.permute.xlu1 %1270 }
 0x106   : > { %v2329_v14 = vsel %vm930_vm14, %v931_v62, %v2261_v19  ;;  %v1182_v6 = vmul.f32 %v1634_v34, %v2289_v31  ;;  %v1154_v5 = vadd.f32 %v1152_v26, %v1138_v60  ;;  %v2335_v12 = vmul.f32 %v2185_v20, %v937_v40 }
 0x107   : > { %v1636_v11 = vpop.eup %1635  ;;  %v1161_v59 = vsub.f32 1.5, %v2272_v35  ;;  %v2340_v29 = vmul.f32 %v2276_v36, %v2237_v16  ;;  %1643 = vrcp.f32 %v2314_v38  ;;  %v962_v62 = vmul.f32 %v1632_v23, %v961_v17 }
 0x108   : > { %v2343_v0 = vpop.eup %1637  ;;  %v1183_v15 = vmul.f32 %v1634_v34, %v1182_v6  ;;  %v2345_v19 = vmax.f32 %v1154_v5, 0.0  ;;  %v1296_v51 = vsel %vm1277_vm0, %v1636_v11, 0.0  ;;  %v2348_v9 = vmul.f32 0.5, %v1053_v2 }
 0x109   : > { %v1090_v20 = vmul.f32 %v2343_v0, %v2298_v50  ;;  %vm964_vm3 = vcmp.eq.f32.partialorder %v2256_v44, inf  ;;  %1297 = vadd.xlane.f32.xlu2 %v1296_v51  ;;  %v1263_v40 = vlaneseq  ;;  %v963_v18 = vmul.f32 %v962_v62, %v2256_v44 }
 0x10a   : > { %v1640_v7 = vpop.eup %1639  ;;  %vm966_vm4 = vcmp.eq.f32.partialorder %v2256_v44, 0.0  ;;  %v1184_v25 = vmul.f32 0.5, %v1183_v15  ;;  %1645 = vrsqrt.f32 %v2345_v19  ;;  %v967_v45 = vand.u32 2147483648, %v2256_v44 }
 0x10b   : > { %v1642_v61 = vpop.eup %1641  ;;  %v1091_v21 = vsub.f32 1.0, %v1090_v20  ;;  %vm1188_vm5 = vcmp.eq.f32.partialorder %v2289_v31, inf  ;;  %vm1190_vm6 = vcmp.eq.f32.partialorder %v2289_v31, 0.0  ;;  %v965_v23 = vsel %vm964_vm3, %v2256_v44, %v963_v18 }
 0x10c   : > { %v1185_v27 = vsub.f32 1.5, %v1184_v25  ;;  %v1191_v13 = vand.u32 2147483648, %v2289_v31  ;;  %v1076_v32 = vmul.f32 %v1642_v61, %v2308_v58  ;;  %v968_v37 = vsel %vm966_vm4, %v967_v45, %v965_v23 }
 0x10d   : > { %v1644_v33 = vpop.eup %1643  ;;  %v1299_v4 = vsel %vm1277_vm0, %v1640_v7, 0.0  ;;  %v1264_v41 = vand.u32 127, %v1263_v40  ;;  %v1268_v43 = vperm.slane %v1267_v8, 0  ;;  %v1092_v3 = vmul.f32 %v2343_v0, %v1091_v21 }
 0x10e   : > { %v972_v47 = vmul.f32 %v1644_v33, %v2314_v38  ;;  %v2365_v48 = vadd.f32 1e-06, %v968_v37  ;;  %v1186_v39 = vmul.f32 %v1634_v34, %v1185_v27  ;;  %vm1094_vm7 = vweird.f32 %v2298_v50 }
 0x10f   : > { %v1098_v44 = vand.u32 2147483647, %v2298_v50  ;;  %v1100_v52 = vand.u32 2147483648, %v2298_v50  ;;  %v1077_v54 = vmul.f32 %v1642_v61, %v1076_v32  ;;  %vm976_vm8 = vweird.f32 %v2314_v38 }
 0x110   : > { %v1646_v53 = vpop.eup %1645  ;;  %v973_v56 = vsub.f32 1.0, %v972_v47  ;;  %v982_v60 = vand.u32 2147483648, %v2314_v38  ;;  %1647 = vrcp.f32 %v2365_v48  ;;  %vm1095_vm9 = vweird.f32 %v2343_v0 }
 0x111   : > { %v1187_v26 = vmul.f32 %v1186_v39, %v2289_v31  ;;  %v1078_v34 = vmul.f32 0.5, %v1077_v54  ;;  %1300 = vadd.xlane.f32.xlu2 %v1299_v4  ;;  %vm2375_vm10 = vcmp.eq.s32.totalorder %v1264_v41, %v1268_v43  ;;  %v1093_v17 = vadd.f32 %v2343_v0, %v1092_v3  ;;  %vm2387_vm12 = vmor %vm1094_vm7, %vm1095_vm9 }
 0x112   : > { %v974_v6 = vmul.f32 %v1644_v33, %v973_v56  ;;  %vm977_vm11 = vweird.f32 %v1644_v33  ;;  %v1194_v5 = vmul.f32 %v1646_v53, %v2345_v19  ;;  %v980_v11 = vand.u32 2147483647, %v2314_v38 }
 0x113   : > { %v1189_v62 = vsel %vm1188_vm5, %v2289_v31, %v1187_v26  ;;  %v1079_v15 = vsub.f32 1.5, %v1078_v34  ;;  %v1272_v51 = vperm.slane %v1271_v55, 0  ;;  %v1275_v25 = vsel %vm2375_vm10, %v2038_v24, 0.0  ;;  %vm978_vm13 = vmor %vm976_vm8, %vm977_vm11 }
 0x114   : > { %v975_v40 = vadd.f32 %v1644_v33, %v974_v6  ;;  %v1192_v7 = vsel %vm1190_vm6, %v1191_v13, %v1189_v62  ;;  %v1195_v18 = vmul.f32 %v1646_v53, %v1194_v5  ;;  %v1162_v8 = vmul.f32 %v2220_v42, %v1161_v59 }
 0x115   : > { %v983_v50 = vor.u32 1.1754944e-38, %v982_v60  ;;  %v2401_v21 = vadd.f32 1e-06, %v1192_v7  ;;  %v1080_v45 = vmul.f32 %v1642_v61, %v1079_v15  ;;  %v1097_v31 = vsel %vm2387_vm12, %v2343_v0, %v1093_v17 }
 0x116   : > { %v2403_v23 = vpop.eup %1647  ;;  %v979_v27 = vsel %vm978_vm13, %v1644_v33, %v975_v40  ;;  %v1196_v13 = vmul.f32 0.5, %v1195_v18  ;;  %v1278_v24 = vsel %vm1277_vm0, %v1275_v25, 0.0  ;;  %v1171_v42 = vmul.f32 %v2276_v36, %v2340_v29 }
 0x117   : > { %v1101_v35 = vor.u32 1.1754944e-38, %v1100_v52  ;;  %vm981_vm14 = vcmp.eq.f32.partialorder %v980_v11, 8.507059e+37  ;;  %v987_v38 = vmul.f32 %v2403_v23, %v2365_v48  ;;  %vm1099_vm15 = vcmp.eq.f32.partialorder %v1098_v44, 8.507059e+37 }
 0x118   : > { %v984_v59 = vsel %vm981_vm14, %v983_v50, %v979_v27  ;;  %1649 = vrcp.f32 %v2401_v21  ;;  %vm2414_vm1 = vcmp.eq.s32.totalorder %v1264_v41, %v1272_v51  ;;  %v1081_v33 = vmul.f32 %v1080_v45, %v2308_v58 }
 0x119   : > { %v1102_v0 = vsel %vm1099_vm15, %v1101_v35, %v1097_v31  ;;  %v988_v32 = vsub.f32 1.0, %v987_v38  ;;  %v1197_v37 = vsub.f32 1.5, %v1196_v13  ;;  %1279 = vadd.xlane.f32.xlu2 %v1278_v24  ;;  %v1055_v29 = vsub.f32 1.5, %v2348_v9 }
 0x11a   : > { %vm1082_vm2 = vcmp.eq.f32.partialorder %v2308_v58, inf  ;;  %vm1084_vm3 = vcmp.eq.f32.partialorder %v2308_v58, 0.0  ;;  %v1085_v4 = vand.u32 2147483648, %v2308_v58  ;;  %vm940_vm4 = vcmp.eq.f32.partialorder %v2152_v46, inf }
 0x11b   : > { %v985_v41 = vmul.f32 %v984_v59, %v2329_v14  ;;  %v1083_v43 = vsel %vm1082_vm2, %v2308_v58, %v1081_v33  ;;  %v1198_v3 = vmul.f32 %v1646_v53, %v1197_v37  ;;  %v1276_v47 = vsel %vm2414_vm1, %v2036_v22, 0.0 }
 0x11c   : > { %vm1164_vm5 = vcmp.eq.f32.partialorder %v2182_v49, inf  ;;  %v1167_v9 = vand.u32 2147483648, %v2182_v49  ;;  %v1103_v39 = vmul.f32 %v1102_v0, %v2322_v1  ;;  %v1086_v44 = vsel %vm1084_vm3, %v1085_v4, %v1083_v43 }
 0x11d   : > { %v939_v52 = vmul.f32 %v2335_v12, %v2152_v46  ;;  %v989_v54 = vmul.f32 %v2403_v23, %v988_v32  ;;  %v2435_v14 = vadd.f32 1e-06, %v1086_v44  ;;  %v1199_v58 = vmul.f32 %v1198_v3, %v2345_v19 }
 0x11e   : > { %v1650_v53 = vpop.eup %1649  ;;  %v1163_v56 = vmul.f32 %v1162_v8, %v2182_v49  ;;  %v1056_v22 = vmul.f32 %v2250_v28, %v1055_v29  ;;  %v1172_v60 = vmul.f32 0.5, %v1171_v42  ;;  %v1281_v55 = vsel %vm1277_vm0, %v1276_v47, 0.0 }
 0x11f   : > { %vm1166_vm6 = vcmp.eq.f32.partialorder %v2182_v49, 0.0  ;;  %v1001_v1 = vadd.f32 1e-06, %v985_v41  ;;  %v1208_v26 = vmul.f32 %v1650_v53, %v2401_v21  ;;  %1651 = vrcp.f32 %v2435_v14 }
 0x120   : > { %vm1200_vm7 = vcmp.eq.f32.partialorder %v2345_v19, inf  ;;  %v1119_v12 = vadd.f32 1e-06, %v1103_v39  ;;  %vm991_vm8 = vweird.f32 %v2365_v48  ;;  %vm1202_vm9 = vcmp.eq.f32.partialorder %v2345_v19, 0.0 }
 0x121   : > { %v1203_v34 = vand.u32 2147483648, %v2345_v19  ;;  %v990_v28 = vadd.f32 %v2403_v23, %v989_v54  ;;  %vm992_vm0 = vweird.f32 %v2403_v23  ;;  %v1209_v2 = vsub.f32 1.0, %v1208_v26  ;;  %1282 = vadd.xlane.f32.xlu2 %v1281_v55 }
 0x122   : > { %v1201_v17 = vsel %vm1200_vm7, %v2345_v19, %v1199_v58  ;;  %v995_v6 = vand.u32 2147483647, %v2365_v48  ;;  %v997_v5 = vand.u32 2147483648, %v2365_v48  ;;  %v1218_v11 = vand.u32 2147483648, %v2401_v21  ;;  %vm2465_vm11 = vmor %vm991_vm8, %vm992_vm0 }
 0x123   : > { %v1204_v62 = vsel %vm1202_vm9, %v1203_v34, %v1201_v17  ;;  %1653 = vlog2.f32 %v1001_v1  ;;  %v1210_v15 = vmul.f32 %v1650_v53, %v1209_v2  ;;  %vm1213_vm10 = vweird.f32 %v1650_v53 }
 0x124   : > { %v1216_v51 = vand.u32 2147483647, %v2401_v21  ;;  %v941_v20 = vsel %vm940_vm4, %v2152_v46, %v939_v52  ;;  %v1165_v19 = vsel %vm1164_vm5, %v2182_v49, %v1163_v56  ;;  %v1173_v40 = vsub.f32 1.5, %v1172_v60 }
 0x125   : > { %v2469_v18 = vadd.f32 1e-06, %v1204_v62  ;;  %v1652_v25 = vpop.eup %1651  ;;  %1655 = vlog2.f32 %v1119_v12  ;;  %v994_v8 = vsel %vm2465_vm11, %v2403_v23, %v990_v28  ;;  %v1211_v50 = vadd.f32 %v1650_v53, %v1210_v15 }
 0x126   : > { %vm1212_vm12 = vweird.f32 %v2401_v21  ;;  %v998_v45 = vor.u32 1.1754944e-38, %v997_v5  ;;  %v1219_v31 = vor.u32 1.1754944e-38, %v1218_v11  ;;  %v1105_v48 = vmul.f32 %v1652_v25, %v2435_v14 }
 0x127   : > { %vm1214_vm13 = vmor %vm1212_vm12, %vm1213_vm10  ;;  %1657 = vrcp.f32 %v2469_v18  ;;  %v1057_v27 = vmul.f32 %v1056_v22, %v2205_v10  ;;  %vm996_vm14 = vcmp.eq.f32.partialorder %v995_v6, 8.507059e+37  ;;  %vm1217_vm15 = vcmp.eq.f32.partialorder %v1216_v51, 8.507059e+37 }
 0x128   : > { %v1215_v13 = vsel %vm1214_vm13, %v1650_v53, %v1211_v50  ;;  %v1168_v24 = vsel %vm1166_vm6, %v1167_v9, %v1165_v19  ;;  %v999_v42 = vsel %vm996_vm14, %v998_v45, %v994_v8  ;;  %v1106_v35 = vsub.f32 1.0, %v1105_v48 }
 0x129   : > { %v1220_v23 = vsel %vm1217_vm15, %v1219_v31, %v1215_v13  ;;  %v1654_v38 = vpop.eup %1653  ;;  %vm942_vm1 = vcmp.eq.f32.partialorder %v2152_v46, 0.0  ;;  %vm1058_vm2 = vcmp.eq.f32.partialorder %v2205_v10, inf  ;;  %v1115_v59 = vand.u32 2147483648, %v2435_v14 }
 0x12a   : > { %v1221_v21 = vmul.f32 %v1220_v23, %v1168_v24  ;;  %v944_v61 = vsel %vm942_vm1, %v943_v57, %v941_v20  ;;  %v1107_v0 = vmul.f32 %v1652_v25, %v1106_v35  ;;  %vm1110_vm3 = vweird.f32 %v1652_v25 }
 0x12b   : > { %v1113_v32 = vand.u32 2147483647, %v2435_v14  ;;  %v1656_v49 = vpop.eup %1655  ;;  %v1059_v33 = vsel %vm1058_vm2, %v2205_v10, %v1057_v27  ;;  %v1174_v37 = vmul.f32 %v2276_v36, %v1173_v40  ;;  %v1000_v29 = vmul.f32 %v999_v42, %v944_v61 }
 0x12c   : > { %v1237_v4 = vadd.f32 1e-06, %v1221_v21  ;;  %v1061_v43 = vand.u32 2147483648, %v2205_v10  ;;  %v1004_v3 = vmul.f32 0.6931472, %v1654_v38  ;;  %v1108_v47 = vadd.f32 %v1652_v25, %v1107_v0 }
 0x12d   : > { %v1658_v41 = vpop.eup %1657  ;;  %vm1109_vm4 = vweird.f32 %v2435_v14  ;;  %vm1060_vm5 = vcmp.eq.f32.partialorder %v2205_v10, 0.0  ;;  %v1116_v46 = vor.u32 1.1754944e-38, %v1115_v59  ;;  %v1122_v39 = vmul.f32 0.6931472, %v1656_v49 }
 0x12e   : > { %1659 = vlog2.f32 %v1237_v4  ;;  %vm1111_vm6 = vmor %vm1109_vm4, %vm1110_vm3  ;;  %v1223_v57 = vmul.f32 %v1658_v41, %v2469_v18  ;;  %v1062_v9 = vsel %vm1060_vm5, %v1061_v43, %v1059_v33  ;;  %vm1114_vm7 = vcmp.eq.f32.partialorder %v1113_v32, 8.507059e+37 }
 0x12f   : > { %v1112_v44 = vsel %vm1111_vm6, %v1652_v25, %v1108_v47  ;;  %v1175_v36 = vmul.f32 %v1174_v37, %v2237_v16  ;;  %v1002_v52 = vadd.f32 1e-06, %v1000_v29  ;;  %v1007_v53 = vmul.f32 8.685889, %v1004_v3 }
 0x130   : > { %v1117_v54 = vsel %vm1114_vm7, %v1116_v46, %v1112_v44  ;;  %v1224_v58 = vsub.f32 1.0, %v1223_v57  ;;  %v1233_v14 = vand.u32 2147483648, %v2469_v18  ;;  %vm1228_vm8 = vweird.f32 %v1658_v41 }
 0x131   : > { %v1118_v56 = vmul.f32 %v1117_v54, %v1062_v9  ;;  %v1231_v10 = vand.u32 2147483647, %v2469_v18  ;;  %vm1176_vm9 = vcmp.eq.f32.partialorder %v2237_v16, inf  ;;  %v1179_v60 = vand.u32 2147483648, %v2237_v16 }
 0x132   : > { %v1225_v22 = vmul.f32 %v1658_v41, %v1224_v58  ;;  %v1125_v55 = vmul.f32 8.685889, %v1122_v39  ;;  %v1177_v12 = vsel %vm1176_vm9, %v2237_v16, %v1175_v36  ;;  %1661 = vlog2.f32 %v1002_v52 }
 0x133   : > { %v1120_v1 = vadd.f32 1e-06, %v1118_v56  ;;  %vm1227_vm0 = vweird.f32 %v2469_v18  ;;  %v1245_v28 = vmul.f32 0.8, %v1007_v53  ;;  %v1234_v17 = vor.u32 1.1754944e-38, %v1233_v14 }
 0x134   : > { %v1660_v26 = vpop.eup %1659  ;;  %v1226_v34 = vadd.f32 %v1658_v41, %v1225_v22  ;;  %vm1229_vm10 = vmor %vm1227_vm0, %vm1228_vm8  ;;  %vm1178_vm11 = vcmp.eq.f32.partialorder %v2237_v16, 0.0  ;;  %vm1232_vm12 = vcmp.eq.f32.partialorder %v1231_v10, 8.507059e+37  ;;  %v1247_v11 = vmul.f32 0.1, %v1125_v55 }
 0x135   : > { %v1240_v2 = vmul.f32 0.6931472, %v1660_v26  ;;  %1663 = vlog2.f32 %v1120_v1  ;;  %v1180_v5 = vsel %vm1178_vm11, %v1179_v60, %v1177_v12 }
 0x136   : > { %v1230_v6 = vsel %vm1229_vm10, %v1658_v41, %v1226_v34  ;;  %v1249_v20 = vadd.f32 %v1247_v11, %v1245_v28 }
 0x137   : > { %v1243_v62 = vmul.f32 8.685889, %v1240_v2  ;;  %v1235_v15 = vsel %vm1232_vm12, %v1234_v17, %v1230_v6 }
 0x138   : > { %v1236_v51 = vmul.f32 %v1235_v15, %v1180_v5  ;;  %v1662_v40 = vpop.eup %1661 }
 0x139   : > { %v1251_v19 = vmul.f32 0.1, %v1243_v62  ;;  %v1006_v16 = vmul.f32 0.6931472, %v1662_v40 }
 0x13a   : > { %v1238_v7 = vadd.f32 1e-06, %v1236_v51 }
 0x13b   : > { %v1664_v18 = vpop.eup %1663  ;;  %v1253_v25 = vadd.f32 %v1251_v19, %v1249_v20  ;;  %v1008_v31 = vmul.f32 8.685889, %v1006_v16 }
 0x13c   : > { %v1124_v8 = vmul.f32 0.6931472, %v1664_v18  ;;  %1665 = vlog2.f32 %v1238_v7 }
 0x13d   : > { %v1255_v50 = vsub.f32 0.0, %v1253_v25  ;;  %v1246_v24 = vmul.f32 0.8, %v1008_v31 }
 0x13e   : > { %v1126_v45 = vmul.f32 8.685889, %v1124_v8 }
 0x13f   : > { %1257 = vst [vmem:[%s494_s1] sm:$0x1] %v1255_v50 }
 0x140   : > { %v1248_v27 = vmul.f32 0.1, %v1126_v45 }
 0x142   : > { %v1666_v48 = vpop.eup %1665  ;;  %v1250_v23 = vadd.f32 %v1248_v27, %v1246_v24 }
 0x143   : > { %v1242_v13 = vmul.f32 0.6931472, %v1666_v48 }
 0x145   : > { %v1244_v42 = vmul.f32 8.685889, %v1242_v13 }
 0x147   : > { %v1252_v35 = vmul.f32 0.1, %v1244_v42 }
 0x149   : > { %v1254_v38 = vadd.f32 %v1252_v35, %v1250_v23 }
 0x14b   : > { %v1256_v21 = vsub.f32 0.0, %v1254_v38 }
 0x14d   : > { %1258 = vst [vmem:[%s494_s1 + $0x1] sm:$0x1] %v1256_v21 }
 0x17c   : > { %v1298_v59 = vpop.xlane.xlu2 %1297 }
 0x17d   : > { %1667 = vlog2.f32 %v1298_v59 }
 0x183   : > { %v1668_v61 = vpop.eup %1667 }
 0x184   : > { %v1301_v0 = vpop.xlane.xlu2 %1300  ;;  %v1303_v32 = vmul.f32 0.6931472, %v1668_v61 }
 0x185   : > { %1669 = vlog2.f32 %v1301_v0 }
 0x186   : > { %v1306_v49 = vadd.f32 %v1303_v32, %v2268_v63 }
 0x18b   : > { %v1670_v33 = vpop.eup %1669 }
 0x18c   : > { %v1280_v37 = vpop.xlane.xlu2 %1279  ;;  %v1305_v4 = vmul.f32 0.6931472, %v1670_v33 }
 0x18d   : > { %v1308_v29 = vsub.f32 %v1306_v49, %v1280_v37 }
 0x18e   : > { %v1307_v41 = vadd.f32 %v1305_v4, %v2270_v30 }
 0x18f   : > { %1310 = vst [vmem:[%s499_s0] sm:$0x1] %v1308_v29 }
 0x194   : > { %v1283_v43 = vpop.xlane.xlu2 %1282 }
 0x195   : > { %v1309_v3 = vsub.f32 %v1307_v41, %v1283_v43 }
 0x197   : > { %1311 = vst [vmem:[%s499_s0 + $0x1] sm:$0x1] %v1309_v3 }
 0x198 PF: > { %s27_s29 = sadd.s32 1, %s1849_s29   ;;  %s2560_s28 = sld [smem:[#allocation13_spill]] }
 0x199   : > { %p24_p0 = scmp.ge.s32.totalorder %s27_s29, 4   ;;  %s2561_s26 = sld [smem:[#allocation16_spill]] }
 0x19a   : > { %s2562_s27 = sld [smem:[#allocation14_spill]]  ;;  %s2564_s24 = smov %s1833_s25 }
 0x19b   : > { %s2563_s12 = sld [smem:[#allocation15_spill]] }
 0x19d   :  { %26 = sbr.rel (!%p24_p0) target bundleno = 11 (0xb), region = 157 }
 0x19e   : > { %s2565_s25 = smov %s2560_s28 }
 0x1a1   : > { %s2566_s28 = smov %s2563_s12 }
 0x1a2   :  { %1347 = vsyncpa [#allocation4], 1 }
 0x1a3   :  { %1349 = vsyncpa [#allocation4 + $0x1], 1 }
 0x1a4   :  { %1350 = vsyncpa [#allocation6], 1 }
 0x1a5   :  { %1352 = vsyncpa [#allocation6 + $0x1], 1 }
 0x1a6   :  { %1353 = vsyncpa [#allocation9], 1 }
 0x1a7   :  { %1355 = vsyncpa [#allocation9 + $0x1], 1 }

</bundles_post_ra>
